<compile_context>
chip_gen: v7x
topology: tpu7x:2x2x1
jax: 0.10.0
libtpu: 0.0.40
codegen_flags: <defaults>
</compile_context>

<pallas_src>
import jax
import jax.numpy as jnp
from jax.experimental import pallas as pl
from jax.experimental.pallas import tpu as pltpu


D_IN = 1024
H1, H2 = 500, 150          # logical hidden widths (PyTorch module)
H1_PAD, H2_PAD = 512, 256  # lane-padded hidden widths


def _round_up(n, m):
    return ((n + m - 1) // m) * m


def _block_spec(block_shape, index_map, *, buffers=None):
    """BlockSpec with optional pipeline depth (pl.Buffered); falls back to a
    plain BlockSpec if the installed Pallas version rejects `pipeline_mode`."""
    if buffers is not None:
        try:
            return pl.BlockSpec(block_shape, index_map,
                                pipeline_mode=pl.Buffered(buffers))
        except Exception:
            pass
    return pl.BlockSpec(block_shape, index_map)


def fc_kernel(x_ref, w1_ref, w2_ref, w3_ref, b_ref, o_ref):
    """Fused Linear->ReLU->Linear->ReLU->Linear on one batch tile.

    MXU operands are bf16 (weights stored bf16, activations already bf16 or
    cast right before each dot); accumulation and all VPU work (bias add,
    ReLU) stay in f32.
    """
    h1p = w1_ref.shape[1]
    h2p = w2_ref.shape[1]
    b1 = b_ref[:, 0:h1p]
    b2 = b_ref[:, h1p:h1p + h2p]
    b3 = b_ref[:, h1p + h2p:]

    x = x_ref[...]
    if x.dtype != jnp.bfloat16:          # no-op when x streams in as bf16
        x = x.astype(jnp.bfloat16)

    h1 = jnp.dot(x, w1_ref[...], preferred_element_type=jnp.float32)
    h1 = jnp.maximum(h1 + b1, 0.0)

    h2 = jnp.dot(h1.astype(jnp.bfloat16), w2_ref[...],
                 preferred_element_type=jnp.float32)
    h2 = jnp.maximum(h2 + b2, 0.0)

    out = jnp.dot(h2.astype(jnp.bfloat16), w3_ref[...],
                  preferred_element_type=jnp.float32)
    o_ref[...] = (out + b3).astype(o_ref.dtype)


def init_params(key, n_classes):
    """PyTorch-style uniform fan-in init; weights stored [in, out] (f32)."""
    def linear(key, fan_in, fan_out):
        kw, kb = jax.random.split(key)
        bound = 1.0 / jnp.sqrt(fan_in)
        w = jax.random.uniform(kw, (fan_in, fan_out), jnp.float32, -bound, bound)
        b = jax.random.uniform(kb, (1, fan_out), jnp.float32, -bound, bound)
        return w, b

    k1, k2, k3 = jax.random.split(key, 3)
    w1, b1 = linear(k1, D_IN, H1)
    w2, b2 = linear(k2, H1, H2)
    w3, b3 = linear(k3, H2, n_classes)
    return (w1, b1, w2, b2, w3, b3)


def pack_params(params, n_classes):
    """One-time host-side packing:
       * weights zero-padded to lane multiples and cast to bf16 ([in, out])
       * the three biases zero-padded (f32) and concatenated into one row.
    Zero padding is exact: padded hidden units are relu(0+0)=0 and padded
    weight rows are 0, so padded lanes contribute nothing.
    """
    w1, b1, w2, b2, w3, b3 = params
    c_pad = _round_up(max(n_classes, 128), 128)

    def pad_w(w, rows, cols):
        return jnp.pad(w, ((0, rows - w.shape[0]), (0, cols - w.shape[1])))

    def pad_b(b, cols):
        return jnp.pad(b, ((0, 0), (0, cols - b.shape[1])))

    w1p = pad_w(w1, D_IN, H1_PAD).astype(jnp.bfloat16)
    w2p = pad_w(w2, H1_PAD, H2_PAD).astype(jnp.bfloat16)
    w3p = pad_w(w3, H2_PAD, c_pad).astype(jnp.bfloat16)
    bias = jnp.concatenate(
        [pad_b(b1, H1_PAD), pad_b(b2, H2_PAD), pad_b(b3, c_pad)], axis=1
    ).astype(jnp.float32)
    return (w1p, w2p, w3p, bias)


def _choose_batch_tile(B, block_b):
    """Batch tile: full batch when tiny; otherwise >= 2 grid steps (v7x has
    2 TCs) and a 16-row-aligned tile (bf16 sublane packing), capped at
    block_b (keep <= 1024 for v7x's 64 MiB VMEM)."""
    if B < 16:
        return B                                   # full-dim block, 1 step
    return min(block_b, _round_up(pl.cdiv(B, 2), 16))


def fc_forward(x, packed, n_classes, *, block_b=1024, slice_output=True):
    """x: [B, 1024] f32 or bf16.  Returns [B, n_classes] f32 (or the padded
    lane-dense [B, c_pad] output if slice_output=False, saving one HBM pass)."""
    w1p, w2p, w3p, bias = packed
    B, d = x.shape
    assert d == D_IN
    c_pad = w3p.shape[1]

    tb = _choose_batch_tile(B, block_b)
    num_steps = pl.cdiv(B, tb)
    grid = (num_steps,)

    # Deepen the x pipeline only when there are enough steps for it to matter.
    x_buffers = 3 if num_steps >= 3 else None

    flops = 2 * B * (D_IN * H1_PAD + H1_PAD * H2_PAD + H2_PAD * c_pad)
    bytes_accessed = (
        int(x.size) * x.dtype.itemsize
        + sum(int(a.size) * a.dtype.itemsize for a in packed)
        + B * c_pad * 4
    )
    vmem_limit = (64 if tb > 1024 else 32) * 1024 * 1024

    out_padded = pl.pallas_call(
        fc_kernel,
        out_shape=jax.ShapeDtypeStruct((B, c_pad), jnp.float32),
        grid=grid,
        in_specs=[
            _block_spec((tb, D_IN), lambda i: (i, 0), buffers=x_buffers),  # x streams
            _block_spec((D_IN, H1_PAD), lambda i: (0, 0), buffers=1),      # weights stay
            _block_spec((H1_PAD, H2_PAD), lambda i: (0, 0), buffers=1),    #   resident in
            _block_spec((H2_PAD, c_pad), lambda i: (0, 0), buffers=1),     #   VMEM, single-
            _block_spec((1, bias.shape[1]), lambda i: (0, 0), buffers=1),  #   buffered
        ],
        out_specs=pl.BlockSpec((tb, c_pad), lambda i: (i, 0)),
        compiler_params=pltpu.CompilerParams(
            dimension_semantics=("parallel",),
            vmem_limit_bytes=vmem_limit,
        ),
        cost_estimate=pl.CostEstimate(
            flops=flops, transcendentals=0, bytes_accessed=bytes_accessed),
    )(x, w1p, w2p, w3p, bias)

    if slice_output:
        return out_padded[:, :n_classes]
    return out_padded


if __name__ == "__main__":
    key = jax.random.PRNGKey(0)
    kx, kp = jax.random.split(key)

    n_classes = 10
    batch = 8
    x_f32 = jax.random.normal(kx, (batch, D_IN), dtype=jnp.float32)
    # "Upstream" producer emits bf16 activations (halves x DMA on v6e, where
    # the kernel is x-DMA-bound with f32 x).  No standalone cast in fc_forward.
    x = x_f32.astype(jnp.bfloat16)

    params = init_params(kp, n_classes)
    packed = pack_params(params, n_classes)

    out = fc_forward(x, packed, n_classes)
    jax.block_until_ready(out)
    assert out.shape == (batch, n_classes)

    w1, b1, w2, b2, w3, b3 = params

    # Reference 1: identical bf16-operand / f32-accumulate math in plain JAX.
    h1 = jnp.maximum(
        jnp.dot(x, w1.astype(jnp.bfloat16),
                preferred_element_type=jnp.float32) + b1, 0.0)
    h2 = jnp.maximum(
        jnp.dot(h1.astype(jnp.bfloat16), w2.astype(jnp.bfloat16),
                preferred_element_type=jnp.float32) + b2, 0.0)
    ref_bf16 = jnp.dot(h2.astype(jnp.bfloat16), w3.astype(jnp.bfloat16),
                       preferred_element_type=jnp.float32) + b3
    assert jnp.allclose(out, ref_bf16, atol=1e-2, rtol=1e-2)

    # Reference 2: full-f32 PyTorch-equivalent forward on the same
    # (bf16-quantized) input; loose tolerance since the kernel's MXU operands
    # are bf16.
    xr = x.astype(jnp.float32)
    ref_f32 = jnp.maximum(xr @ w1 + b1, 0.0)
    ref_f32 = jnp.maximum(ref_f32 @ w2 + b2, 0.0)
    ref_f32 = ref_f32 @ w3 + b3
    assert jnp.allclose(out, ref_f32, atol=1e-1, rtol=1e-1)

    # Multi-step path: batch=64 -> tb=32, grid=(2,) ("parallel" axis spans
    # both TensorCores on v7x).
    xb = jax.random.normal(jax.random.PRNGKey(1), (64, D_IN),
                           dtype=jnp.float32).astype(jnp.bfloat16)
    out_b = fc_forward(xb, packed, n_classes)
    jax.block_until_ready(out_b)
    assert out_b.shape == (64, n_classes)
    h1b = jnp.maximum(
        jnp.dot(xb, w1.astype(jnp.bfloat16),
                preferred_element_type=jnp.float32) + b1, 0.0)
    h2b = jnp.maximum(
        jnp.dot(h1b.astype(jnp.bfloat16), w2.astype(jnp.bfloat16),
                preferred_element_type=jnp.float32) + b2, 0.0)
    ref_b = jnp.dot(h2b.astype(jnp.bfloat16), w3.astype(jnp.bfloat16),
                    preferred_element_type=jnp.float32) + b3
    assert jnp.allclose(out_b, ref_b, atol=1e-2, rtol=1e-2)

    print("KERNEL_OK")
</pallas_src>

<mosaic_0001>
module attributes {stable_mosaic.version = 11 : i64} {
  func.func @fc_kernel(%arg0: i32, %arg1: memref<8x1024xbf16, #tpu.memory_space<vmem>>, %arg2: memref<1024x512xbf16, #tpu.memory_space<vmem>>, %arg3: memref<512x256xbf16, #tpu.memory_space<vmem>>, %arg4: memref<256x128xbf16, #tpu.memory_space<vmem>>, %arg5: memref<1x896xf32, #tpu.memory_space<vmem>>, %arg6: memref<8x128xf32, #tpu.memory_space<vmem>>) attributes {dimension_semantics = [#tpu.dimension_semantics<parallel>], iteration_bounds = array<i64: 1>, scalar_prefetch = 0 : i64, scratch_operands = 0 : i64, tpu.core_type = #tpu.core_type<tc>, window_params = [{transform_indices = @transform_0, window_bounds = array<i64: 8, 1024>}, {pipeline_mode = #tpu.pipeline_mode<synchronous>, transform_indices = @transform_1, window_bounds = array<i64: 1024, 512>}, {pipeline_mode = #tpu.pipeline_mode<synchronous>, transform_indices = @transform_2, window_bounds = array<i64: 512, 256>}, {pipeline_mode = #tpu.pipeline_mode<synchronous>, transform_indices = @transform_3, window_bounds = array<i64: 256, 128>}, {pipeline_mode = #tpu.pipeline_mode<synchronous>, transform_indices = @transform_4, window_bounds = array<i64: 1, 896>}, {transform_indices = @transform_5, window_bounds = array<i64: 8, 128>}]} {
    %c0 = arith.constant 0 : index
    %c0_0 = arith.constant 0 : index
    %0 = vector.load %arg5[%c0, %c0_0] : memref<1x896xf32, #tpu.memory_space<vmem>>, vector<1x512xf32>
    %c0_1 = arith.constant 0 : index
    %c512 = arith.constant 512 : index
    %1 = vector.load %arg5[%c0_1, %c512] : memref<1x896xf32, #tpu.memory_space<vmem>>, vector<1x256xf32>
    %c0_2 = arith.constant 0 : index
    %c768 = arith.constant 768 : index
    %2 = vector.load %arg5[%c0_2, %c768] : memref<1x896xf32, #tpu.memory_space<vmem>>, vector<1x128xf32>
    %c0_3 = arith.constant 0 : index
    %c0_4 = arith.constant 0 : index
    %3 = vector.load %arg1[%c0_3, %c0_4] : memref<8x1024xbf16, #tpu.memory_space<vmem>>, vector<8x1024xbf16>
    %c0_5 = arith.constant 0 : index
    %c0_6 = arith.constant 0 : index
    %4 = vector.load %arg2[%c0_5, %c0_6] : memref<1024x512xbf16, #tpu.memory_space<vmem>>, vector<1024x512xbf16>
    %cst = arith.constant dense<0.000000e+00> : vector<8x512xf32>
    %5 = tpu.matmul %3, %4, %cst {dimension_numbers = #tpu.dot_dimension_numbers<[1], [0], [0], [1], [0, 0, 1, 1], [], []>} : vector<8x1024xbf16>, vector<1024x512xbf16>, vector<8x512xf32> -> vector<8x512xf32>
    %6 = vector.broadcast %0 : vector<1x512xf32> to vector<8x512xf32>
    %7 = arith.addf %5, %6 : vector<8x512xf32>
    %cst_7 = arith.constant 0.000000e+00 : f32
    %8 = vector.broadcast %cst_7 : f32 to vector<8x512xf32>
    %9 = arith.maximumf %7, %8 : vector<8x512xf32>
    %10 = arith.truncf %9 : vector<8x512xf32> to vector<8x512xbf16>
    %c0_8 = arith.constant 0 : index
    %c0_9 = arith.constant 0 : index
    %11 = vector.load %arg3[%c0_8, %c0_9] : memref<512x256xbf16, #tpu.memory_space<vmem>>, vector<512x256xbf16>
    %cst_10 = arith.constant dense<0.000000e+00> : vector<8x256xf32>
    %12 = tpu.matmul %10, %11, %cst_10 {dimension_numbers = #tpu.dot_dimension_numbers<[1], [0], [0], [1], [0, 0, 1, 1], [], []>} : vector<8x512xbf16>, vector<512x256xbf16>, vector<8x256xf32> -> vector<8x256xf32>
    %13 = vector.broadcast %1 : vector<1x256xf32> to vector<8x256xf32>
    %14 = arith.addf %12, %13 : vector<8x256xf32>
    %cst_11 = arith.constant 0.000000e+00 : f32
    %15 = vector.broadcast %cst_11 : f32 to vector<8x256xf32>
    %16 = arith.maximumf %14, %15 : vector<8x256xf32>
    %17 = arith.truncf %16 : vector<8x256xf32> to vector<8x256xbf16>
    %c0_12 = arith.constant 0 : index
    %c0_13 = arith.constant 0 : index
    %18 = vector.load %arg4[%c0_12, %c0_13] : memref<256x128xbf16, #tpu.memory_space<vmem>>, vector<256x128xbf16>
    %cst_14 = arith.constant dense<0.000000e+00> : vector<8x128xf32>
    %19 = tpu.matmul %17, %18, %cst_14 {dimension_numbers = #tpu.dot_dimension_numbers<[1], [0], [0], [1], [0, 0, 1, 1], [], []>} : vector<8x256xbf16>, vector<256x128xbf16>, vector<8x128xf32> -> vector<8x128xf32>
    %20 = vector.broadcast %2 : vector<1x128xf32> to vector<8x128xf32>
    %21 = arith.addf %19, %20 : vector<8x128xf32>
    %c0_15 = arith.constant 0 : index
    %c0_16 = arith.constant 0 : index
    %22 = vector.load %arg6[%c0_15, %c0_16] : memref<8x128xf32, #tpu.memory_space<vmem>>, vector<8x128xf32>
    tpu.vector_store %arg6[%c0_15, %c0_16], %21 {strides = array<i32>} : memref<8x128xf32, #tpu.memory_space<vmem>>, vector<8x128xf32>,
    return
  }
  func.func @transform_0(%arg0: i32) -> (i32, i32) {
    %c0_i32 = arith.constant 0 : i32
    %c0_i32_0 = arith.constant 0 : i32
    return %arg0, %c0_i32 : i32, i32
  }
  func.func @transform_1(%arg0: i32) -> (i32, i32) {
    %c0_i32 = arith.constant 0 : i32
    %c0_i32_0 = arith.constant 0 : i32
    %c0_i32_1 = arith.constant 0 : i32
    return %c0_i32, %c0_i32_0 : i32, i32
  }
  func.func @transform_2(%arg0: i32) -> (i32, i32) {
    %c0_i32 = arith.constant 0 : i32
    %c0_i32_0 = arith.constant 0 : i32
    %c0_i32_1 = arith.constant 0 : i32
    return %c0_i32, %c0_i32_0 : i32, i32
  }
  func.func @transform_3(%arg0: i32) -> (i32, i32) {
    %c0_i32 = arith.constant 0 : i32
    %c0_i32_0 = arith.constant 0 : i32
    %c0_i32_1 = arith.constant 0 : i32
    return %c0_i32, %c0_i32_0 : i32, i32
  }
  func.func @transform_4(%arg0: i32) -> (i32, i32) {
    %c0_i32 = arith.constant 0 : i32
    %c0_i32_0 = arith.constant 0 : i32
    %c0_i32_1 = arith.constant 0 : i32
    return %c0_i32, %c0_i32_0 : i32, i32
  }
  func.func @transform_5(%arg0: i32) -> (i32, i32) {
    %c0_i32 = arith.constant 0 : i32
    %c0_i32_0 = arith.constant 0 : i32
    return %arg0, %c0_i32 : i32, i32
  }
}

</mosaic_0001>

<bundles_post_ra>
// kernel: tpu_custom_call.1
= control target key start
LH: loop header
LB: loop body
LE: loop exit
PB: predicated region body
PF: predicated region fallthrough
CT: control target
= control target key end

     0   :  { %10 = vsyncpa [#allocation3], 0  ;;  %s3882_s0 = inlined_call_operand.hbm [shape: bf16[8,1024], index: 0, kind: input, shape index: {}]   ;;  %s3883_s1 = inlined_call_operand.hbm [shape: bf16[1024,512], index: 1, kind: input, shape index: {}]   ;;  %s3884_s2 = inlined_call_operand.hbm [shape: bf16[512,256], index: 2, kind: input, shape index: {}]   ;;  %s3885_s3 = inlined_call_operand.hbm [shape: bf16[256,128], index: 3, kind: input, shape index: {}]   ;;  %s3886_s4 = inlined_call_operand.vmem [shape: f32[1,896], index: 4, kind: input, shape index: {}]   ;;  %s3887_s5 = inlined_call_operand.hbm [shape: f32[8,128], index: 5, kind: output, shape index: {}]  }
   0x1   :  { %11 = vsyncpa [#allocation6], 0 }
   0x2   :  { %12 = vsyncpa [#allocation9], 0 }
   0x3   :  { %13 = vsyncpa [#allocation4], 0  ;;  %s3708_s18 = smov [#allocation5]   ;;  %s3590_s22 = scalar_lea.hbm %s3883_s1, 32768 }
   0x4   :  { %s29_s19 = sshll.u32 %s3708_s18, 4  ;;  %p3591_p0 = scmp.ne.s32.totalorder %s3883_s1, %s3590_s22  ;;  %s30_s19 = int_to_ptr.vmem [resolvable:$true] %s29_s19 }
   0x5   :  { %p3594_p1 = scmp.lt.u32.totalorder %s3590_s22, %s3883_s1 }
   0x7   :  { %p3596_p2 = pnand %p3594_p1, %p3591_p0 }
   0x9   :  { %3599 = shalt.err (!%p3596_p2)
}
   0xa   :  { %s3600_s27 = scalar_lea.vmem %s30_s19, 32768  ;;  %p3605_p4 = scmp.lt.s32.totalorder %s30_s19, %s30_s19 }
   0xb   :  { %p3601_p3 = scmp.ne.s32.totalorder %s30_s19, %s3600_s27  ;;  %p3606_p5 = scmp.lt.s32.totalorder %s3600_s27, %s3600_s27 }
   0xd   :  { %p3607_p6 = por %p3606_p5, %p3605_p4 }
   0xf   :  { %p3608_p7 = pnand %p3607_p6, %p3601_p3 }
  0x11   :  { %3611 = shalt.err (!%p3608_p7)
}
  0x12   :  { %s3709_s28 = smov 256   ;;  %s3710_s29 = smov 16  }
  0x13   :  { %35 = dma.hbm_to_vmem [thread:$0]  %s3883_s1, 32768, %s30_s19, [#allocation6], %s3709_s28, %s3709_s28, %s3710_s29  }
  0x14   :  { %s3711_s7 = smov [#allocation2]   ;;  %s3712_s9 = smov [#allocation7]  }
  0x15   :  { %s20_s8 = sshll.u32 %s3711_s7, 4  ;;  %s41_s10 = sshll.u32 %s3712_s9, 4  ;;  %s21_s8 = int_to_ptr.vmem [resolvable:$true] %s20_s8  ;;  %s42_s10 = int_to_ptr.vmem [resolvable:$true] %s41_s10 }
  0x16   :  { %s3612_s13 = scalar_lea.hbm %s3882_s0, 512 }
  0x17   :  { %p3613_p8 = scmp.ne.s32.totalorder %s3882_s0, %s3612_s13  ;;  %p3616_p9 = scmp.lt.u32.totalorder %s3612_s13, %s3882_s0 }
  0x19   :  { %p3618_p10 = pnand %p3616_p9, %p3613_p8 }
  0x1b   :  { %3621 = shalt.err (!%p3618_p10)
}
  0x1c   :  { %s3622_s1 = scalar_lea.vmem %s21_s8, 512  ;;  %p3627_p12 = scmp.lt.s32.totalorder %s21_s8, %s21_s8 }
  0x1d   :  { %p3623_p11 = scmp.ne.s32.totalorder %s21_s8, %s3622_s1  ;;  %p3628_p13 = scmp.lt.s32.totalorder %s3622_s1, %s3622_s1 }
  0x1f   :  { %p3629_p0 = por %p3628_p13, %p3627_p12 }
  0x21   :  { %p3630_p1 = pnand %p3629_p0, %p3623_p11 }
  0x23   :  { %3633 = shalt.err (!%p3630_p1)
}
  0x24   :  { %23 = dma.hbm_to_vmem [thread:$0]  %s3882_s0, 512, %s21_s8, [#allocation3]  }
  0x25   :  { %s3634_s22 = scalar_lea.hbm %s3884_s2, 8192 }
  0x26   :  { %p3635_p2 = scmp.ne.s32.totalorder %s3884_s2, %s3634_s22  ;;  %p3638_p3 = scmp.lt.u32.totalorder %s3634_s22, %s3884_s2 }
  0x28   :  { %p3640_p4 = pnand %p3638_p3, %p3635_p2 }
  0x2a   :  { %3643 = shalt.err (!%p3640_p4)
}
  0x2b   :  { %s3644_s27 = scalar_lea.vmem %s42_s10, 8192  ;;  %p3649_p6 = scmp.lt.s32.totalorder %s42_s10, %s42_s10 }
  0x2c   :  { %p3645_p5 = scmp.ne.s32.totalorder %s42_s10, %s3644_s27  ;;  %p3650_p7 = scmp.lt.s32.totalorder %s3644_s27, %s3644_s27 }
  0x2e   :  { %p3651_p8 = por %p3650_p7, %p3649_p6 }
  0x30   :  { %p3652_p9 = pnand %p3651_p8, %p3645_p5 }
  0x32   :  { %3655 = shalt.err (!%p3652_p9)
}
  0x33   :  { %s3713_s0 = smov 128   ;;  %s3714_s28 = smov 8  }
  0x34   :  { %47 = dma.hbm_to_vmem [thread:$0]  %s3884_s2, 8192, %s42_s10, [#allocation6], %s3713_s0, %s3713_s0, %s3714_s28  }
  0x35   :  { %s3715_s6 = smov [#allocation8]   ;;  %s3656_s11 = scalar_lea.hbm %s3885_s3, 2048 }
  0x36   :  { %s53_s7 = sshll.u32 %s3715_s6, 4  ;;  %p3657_p10 = scmp.ne.s32.totalorder %s3885_s3, %s3656_s11  ;;  %s54_s7 = int_to_ptr.vmem [resolvable:$true] %s53_s7 }
  0x37   :  { %p3660_p11 = scmp.lt.u32.totalorder %s3656_s11, %s3885_s3 }
  0x39   :  { %p3662_p12 = pnand %p3660_p11, %p3657_p10 }
  0x3b   :  { %3665 = shalt.err (!%p3662_p12)
}
  0x3c   :  { %s3666_s16 = scalar_lea.vmem %s54_s7, 2048  ;;  %p3671_p0 = scmp.lt.s32.totalorder %s54_s7, %s54_s7 }
  0x3d   :  { %p3667_p13 = scmp.ne.s32.totalorder %s54_s7, %s3666_s16  ;;  %p3672_p1 = scmp.lt.s32.totalorder %s3666_s16, %s3666_s16 }
  0x3f   :  { %p3673_p2 = por %p3672_p1, %p3671_p0 }
  0x41   :  { %p3674_p3 = pnand %p3673_p2, %p3667_p13 }
  0x43   :  { %3677 = shalt.err (!%p3674_p3)
}
  0x44   :  { %s3716_s2 = smov 64   ;;  %s3717_s10 = smov 4  }
  0x45   :  { %59 = dma.hbm_to_vmem [thread:$0]  %s3885_s3, 2048, %s54_s7, [#allocation9], %s3716_s2, %s3716_s2, %s3717_s10  }
  0x46   :  { %3700 = dma.done.wait [#allocation3], 512  }
  0x47   :  { %3701 = vsyncadd [#allocation3], 4294966784 }
  0x48   :  { %3702 = dma.done.wait [#allocation6], 40960  }
  0x49   :  { %3703 = vsyncadd [#allocation6], 4294926336 }
  0x4a   :  { %3704 = dma.done.wait [#allocation9], 2048  }
  0x4b   :  { %3705 = vsyncadd [#allocation9], 4294965248  ;;  %v3086_v0 = vld [vmem:[#allocation5 + $0x4] ss:$16 sps:$4 sm:$0xff]   ;;  %v3090_v2 = vld [vmem:[#allocation5] ss:$16 sps:$4 sm:$0xff]  }
  0x4c   :  { %v3088_v1 = vld [vmem:[#allocation5 + $0x204] ss:$16 sps:$4 sm:$0xff]   ;;  %1667 = vmatprep.subr.bf16.mxu1 %v3086_v0  ;;  %v3091_v3 = vld [vmem:[#allocation5 + $0x200] ss:$16 sps:$4 sm:$0xff]   ;;  %v79_v48 = vld [vmem:[#allocation2 + $0x8] sm:$0xff]  ;;  %s3718_s23 = smov [#allocation10]  }
  0x4d   :  { %1708 = vmatprep.subr.bf16.mxu0 %v3088_v1  ;;  %v3092_v4 = vld [vmem:[#allocation5 + $0x24] ss:$16 sps:$4 sm:$0xff]   ;;  %1668 = vmatpush1.bf16.msra.mxu1 %v3090_v2  ;;  %v3096_v6 = vld [vmem:[#allocation5 + $0x20] ss:$16 sps:$4 sm:$0xff]   ;;  %v3799_v51 = vcombine.high %v79_v48, %v79_v48  ;;  %s2665_s24 = sshll.u32 %s3718_s23, 4  ;;  %s2666_s24 = int_to_ptr.vmem [resolvable:$true] %s2665_s24 }
  0x4e   :  { %1709 = vmatpush1.bf16.msra.mxu0 %v3091_v3  ;;  %v3094_v5 = vld [vmem:[#allocation5 + $0x224] ss:$16 sps:$4 sm:$0xff]   ;;  %1669 = vmatprep.subr.bf16.mxu1 %v3092_v4  ;;  %v3097_v7 = vld [vmem:[#allocation5 + $0x220] ss:$16 sps:$4 sm:$0xff]   ;;  %s3678_s25 = scalar_lea.vmem %s2666_s24, 128  ;;  %p3683_p5 = scmp.lt.s32.totalorder %s2666_s24, %s2666_s24 }
  0x4f   :  { %1710 = vmatprep.subr.bf16.mxu0 %v3094_v5  ;;  %v3098_v8 = vld [vmem:[#allocation5 + $0x44] ss:$16 sps:$4 sm:$0xff]   ;;  %v3102_v10 = vld [vmem:[#allocation5 + $0x40] ss:$16 sps:$4 sm:$0xff]   ;;  %1740 = vmatprep.mubr.bf16.mxu0 %v3799_v51  ;;  %v3191_v5 = vld [vmem:[#allocation5 + $0xc] ss:$16 sps:$4 sm:$0xff]   ;;  %p3679_p4 = scmp.ne.s32.totalorder %s2666_s24, %s3678_s25  ;;  %p3684_p6 = scmp.lt.s32.totalorder %s3678_s25, %s3678_s25 }
  0x50   :  { %v3100_v9 = vld [vmem:[#allocation5 + $0x244] ss:$16 sps:$4 sm:$0xff]   ;;  %v3103_v11 = vld [vmem:[#allocation5 + $0x240] ss:$16 sps:$4 sm:$0xff]  }
  0x51   :  { %1670 = vmatpush1.bf16.msra.mxu1 %v3096_v6  ;;  %v3104_v12 = vld [vmem:[#allocation5 + $0x64] ss:$16 sps:$4 sm:$0xff]   ;;  %v3108_v14 = vld [vmem:[#allocation5 + $0x60] ss:$16 sps:$4 sm:$0xff]   ;;  %p3685_p7 = por %p3684_p6, %p3683_p5 }
  0x52   :  { %1711 = vmatpush1.bf16.msra.mxu0 %v3097_v7  ;;  %1671 = vmatprep.subr.bf16.mxu1 %v3098_v8  ;;  %v3106_v13 = vld [vmem:[#allocation5 + $0x264] ss:$16 sps:$4 sm:$0xff]   ;;  %v3109_v15 = vld [vmem:[#allocation5 + $0x260] ss:$16 sps:$4 sm:$0xff]   ;;  %v3805_v7 = vcombine.low %v79_v48, %v79_v48 }
  0x53   :  { %1712 = vmatprep.subr.bf16.mxu0 %v3100_v9  ;;  %v3110_v16 = vld [vmem:[#allocation5 + $0x84] ss:$16 sps:$4 sm:$0xff]   ;;  %v3114_v18 = vld [vmem:[#allocation5 + $0x80] ss:$16 sps:$4 sm:$0xff]   ;;  %v3189_v9 = vld [vmem:[#allocation5 + $0x8] ss:$16 sps:$4 sm:$0xff]   ;;  %p3686_p8 = pnand %p3685_p7, %p3679_p4 }
  0x54   :  { %v3112_v17 = vld [vmem:[#allocation5 + $0x284] ss:$16 sps:$4 sm:$0xff]   ;;  %v3115_v19 = vld [vmem:[#allocation5 + $0x280] ss:$16 sps:$4 sm:$0xff]  }
  0x55   :  { %1672 = vmatpush1.bf16.msra.mxu1 %v3102_v10  ;;  %v3116_v20 = vld [vmem:[#allocation5 + $0xa4] ss:$16 sps:$4 sm:$0xff]   ;;  %v3120_v22 = vld [vmem:[#allocation5 + $0xa0] ss:$16 sps:$4 sm:$0xff]  }
  0x56   :  { %1713 = vmatpush1.bf16.msra.mxu0 %v3103_v11  ;;  %1673 = vmatprep.subr.bf16.mxu1 %v3104_v12  ;;  %v3118_v21 = vld [vmem:[#allocation5 + $0x2a4] ss:$16 sps:$4 sm:$0xff]   ;;  %v3121_v23 = vld [vmem:[#allocation5 + $0x2a0] ss:$16 sps:$4 sm:$0xff]   ;;  %v3197_v11 = vld [vmem:[#allocation5 + $0x2c] ss:$16 sps:$4 sm:$0xff]  }
  0x57   :  { %1714 = vmatprep.subr.bf16.mxu0 %v3106_v13  ;;  %v3122_v24 = vld [vmem:[#allocation5 + $0xc4] ss:$16 sps:$4 sm:$0xff]   ;;  %v3126_v26 = vld [vmem:[#allocation5 + $0xc0] ss:$16 sps:$4 sm:$0xff]   ;;  %v3195_v13 = vld [vmem:[#allocation5 + $0x28] ss:$16 sps:$4 sm:$0xff]  }
  0x58   :  { %v3124_v25 = vld [vmem:[#allocation5 + $0x2c4] ss:$16 sps:$4 sm:$0xff]   ;;  %v3127_v27 = vld [vmem:[#allocation5 + $0x2c0] ss:$16 sps:$4 sm:$0xff]  }
  0x59   :  { %1674 = vmatpush1.bf16.msra.mxu1 %v3108_v14  ;;  %v3128_v28 = vld [vmem:[#allocation5 + $0xe4] ss:$16 sps:$4 sm:$0xff]   ;;  %v3132_v30 = vld [vmem:[#allocation5 + $0xe0] ss:$16 sps:$4 sm:$0xff]  }
  0x5a   :  { %1715 = vmatpush1.bf16.msra.mxu0 %v3109_v15  ;;  %1675 = vmatprep.subr.bf16.mxu1 %v3110_v16  ;;  %v3130_v29 = vld [vmem:[#allocation5 + $0x2e4] ss:$16 sps:$4 sm:$0xff]   ;;  %v3133_v31 = vld [vmem:[#allocation5 + $0x2e0] ss:$16 sps:$4 sm:$0xff]   ;;  %v3203_v15 = vld [vmem:[#allocation5 + $0x4c] ss:$16 sps:$4 sm:$0xff]  }
  0x5b   :  { %1716 = vmatprep.subr.bf16.mxu0 %v3112_v17  ;;  %v3134_v32 = vld [vmem:[#allocation5 + $0x104] ss:$16 sps:$4 sm:$0xff]   ;;  %v3138_v34 = vld [vmem:[#allocation5 + $0x100] ss:$16 sps:$4 sm:$0xff]   ;;  %v3201_v17 = vld [vmem:[#allocation5 + $0x48] ss:$16 sps:$4 sm:$0xff]  }
  0x5c   :  { %v3136_v33 = vld [vmem:[#allocation5 + $0x304] ss:$16 sps:$4 sm:$0xff]   ;;  %v3139_v35 = vld [vmem:[#allocation5 + $0x300] ss:$16 sps:$4 sm:$0xff]  }
  0x5d   :  { %1676 = vmatpush1.bf16.msra.mxu1 %v3114_v18  ;;  %v3140_v36 = vld [vmem:[#allocation5 + $0x124] ss:$16 sps:$4 sm:$0xff]   ;;  %v3144_v38 = vld [vmem:[#allocation5 + $0x120] ss:$16 sps:$4 sm:$0xff]  }
  0x5e   :  { %1717 = vmatpush1.bf16.msra.mxu0 %v3115_v19  ;;  %1677 = vmatprep.subr.bf16.mxu1 %v3116_v20  ;;  %v3142_v37 = vld [vmem:[#allocation5 + $0x324] ss:$16 sps:$4 sm:$0xff]   ;;  %v3145_v39 = vld [vmem:[#allocation5 + $0x320] ss:$16 sps:$4 sm:$0xff]   ;;  %v3209_v19 = vld [vmem:[#allocation5 + $0x6c] ss:$16 sps:$4 sm:$0xff]  }
  0x5f   :  { %1718 = vmatprep.subr.bf16.mxu0 %v3118_v21  ;;  %v3146_v40 = vld [vmem:[#allocation5 + $0x144] ss:$16 sps:$4 sm:$0xff]   ;;  %v3150_v42 = vld [vmem:[#allocation5 + $0x140] ss:$16 sps:$4 sm:$0xff]   ;;  %v3207_v21 = vld [vmem:[#allocation5 + $0x68] ss:$16 sps:$4 sm:$0xff]  }
  0x60   :  { %v3148_v41 = vld [vmem:[#allocation5 + $0x344] ss:$16 sps:$4 sm:$0xff]   ;;  %v3151_v43 = vld [vmem:[#allocation5 + $0x340] ss:$16 sps:$4 sm:$0xff]  }
  0x61   :  { %1678 = vmatpush1.bf16.msra.mxu1 %v3120_v22  ;;  %v3152_v44 = vld [vmem:[#allocation5 + $0x164] ss:$16 sps:$4 sm:$0xff]   ;;  %v3156_v49 = vld [vmem:[#allocation5 + $0x160] ss:$16 sps:$4 sm:$0xff]  }
  0x62   :  { %1719 = vmatpush1.bf16.msra.mxu0 %v3121_v23  ;;  %1679 = vmatprep.subr.bf16.mxu1 %v3122_v24  ;;  %v3154_v45 = vld [vmem:[#allocation5 + $0x364] ss:$16 sps:$4 sm:$0xff]   ;;  %v3157_v50 = vld [vmem:[#allocation5 + $0x360] ss:$16 sps:$4 sm:$0xff]   ;;  %v3215_v23 = vld [vmem:[#allocation5 + $0x8c] ss:$16 sps:$4 sm:$0xff]  }
  0x63   :  { %1720 = vmatprep.subr.bf16.mxu0 %v3124_v25  ;;  %v78_v46 = vld [vmem:[#allocation2] sm:$0xff]  ;;  %v3213_v25 = vld [vmem:[#allocation5 + $0x88] ss:$16 sps:$4 sm:$0xff]  }
  0x64   :  { %v3797_v47 = vcombine.high %v78_v46, %v78_v46  ;;  %v3158_v52 = vld [vmem:[#allocation5 + $0x184] ss:$16 sps:$4 sm:$0xff]   ;;  %v3162_v54 = vld [vmem:[#allocation5 + $0x180] ss:$16 sps:$4 sm:$0xff]   ;;  %v3803_v6 = vcombine.low %v78_v46, %v78_v46 }
  0x65   :  { %1680 = vmatpush1.bf16.msra.mxu1 %v3126_v26  ;;  %v3160_v53 = vld [vmem:[#allocation5 + $0x384] ss:$16 sps:$4 sm:$0xff]   ;;  %v3163_v55 = vld [vmem:[#allocation5 + $0x380] ss:$16 sps:$4 sm:$0xff]  }
  0x66   :  { %1721 = vmatpush1.bf16.msra.mxu0 %v3127_v27  ;;  %1681 = vmatprep.subr.bf16.mxu1 %v3128_v28  ;;  %v3164_v56 = vld [vmem:[#allocation5 + $0x1a4] ss:$16 sps:$4 sm:$0xff]   ;;  %v3168_v58 = vld [vmem:[#allocation5 + $0x1a0] ss:$16 sps:$4 sm:$0xff]   ;;  %v3221_v27 = vld [vmem:[#allocation5 + $0xac] ss:$16 sps:$4 sm:$0xff]  }
  0x67   :  { %1722 = vmatprep.subr.bf16.mxu0 %v3130_v29  ;;  %1699 = vmatprep.mubr.bf16.mxu1 %v3797_v47  ;;  %v3166_v57 = vld [vmem:[#allocation5 + $0x3a4] ss:$16 sps:$4 sm:$0xff]   ;;  %v3169_v59 = vld [vmem:[#allocation5 + $0x3a0] ss:$16 sps:$4 sm:$0xff]   ;;  %v3219_v29 = vld [vmem:[#allocation5 + $0xa8] ss:$16 sps:$4 sm:$0xff]  }
  0x68   :  { %v3170_v60 = vld [vmem:[#allocation5 + $0x1c4] ss:$16 sps:$4 sm:$0xff]   ;;  %v3174_v62 = vld [vmem:[#allocation5 + $0x1c0] ss:$16 sps:$4 sm:$0xff]  }
  0x69   :  { %1682 = vmatpush1.bf16.msra.mxu1 %v3132_v30  ;;  %v3172_v61 = vld [vmem:[#allocation5 + $0x3c4] ss:$16 sps:$4 sm:$0xff]   ;;  %v3175_v63 = vld [vmem:[#allocation5 + $0x3c0] ss:$16 sps:$4 sm:$0xff]  }
  0x6a   :  { %1723 = vmatpush1.bf16.msra.mxu0 %v3133_v31  ;;  %1683 = vmatprep.subr.bf16.mxu1 %v3134_v32  ;;  %v3176_v0 = vld [vmem:[#allocation5 + $0x1e4] ss:$16 sps:$4 sm:$0xff]   ;;  %v3180_v2 = vld [vmem:[#allocation5 + $0x1e0] ss:$16 sps:$4 sm:$0xff]   ;;  %v3227_v31 = vld [vmem:[#allocation5 + $0xcc] ss:$16 sps:$4 sm:$0xff]  }
  0x6b   :  { %1724 = vmatprep.subr.bf16.mxu0 %v3136_v33  ;;  %v3178_v1 = vld [vmem:[#allocation5 + $0x3e4] ss:$16 sps:$4 sm:$0xff]   ;;  %v3181_v3 = vld [vmem:[#allocation5 + $0x3e0] ss:$16 sps:$4 sm:$0xff]  }
  0x6c   :  { %v3188_v4 = vld [vmem:[#allocation5 + $0x404] ss:$16 sps:$4 sm:$0xff]   ;;  %v3186_v8 = vld [vmem:[#allocation5 + $0x400] ss:$16 sps:$4 sm:$0xff]  }
  0x6d   :  { %1684 = vmatpush1.bf16.msra.mxu1 %v3138_v34  ;;  %v3194_v10 = vld [vmem:[#allocation5 + $0x424] ss:$16 sps:$4 sm:$0xff]   ;;  %v3192_v12 = vld [vmem:[#allocation5 + $0x420] ss:$16 sps:$4 sm:$0xff]  }
  0x6e   :  { %1725 = vmatpush1.bf16.msra.mxu0 %v3139_v35  ;;  %1685 = vmatprep.subr.bf16.mxu1 %v3140_v36  ;;  %v3200_v14 = vld [vmem:[#allocation5 + $0x444] ss:$16 sps:$4 sm:$0xff]   ;;  %v3198_v16 = vld [vmem:[#allocation5 + $0x440] ss:$16 sps:$4 sm:$0xff]   ;;  %v3225_v35 = vld [vmem:[#allocation5 + $0xc8] ss:$16 sps:$4 sm:$0xff]  }
  0x6f   :  { %1726 = vmatprep.subr.bf16.mxu0 %v3142_v37  ;;  %v3206_v18 = vld [vmem:[#allocation5 + $0x464] ss:$16 sps:$4 sm:$0xff]   ;;  %v3204_v20 = vld [vmem:[#allocation5 + $0x460] ss:$16 sps:$4 sm:$0xff]   ;;  %v3233_v37 = vld [vmem:[#allocation5 + $0xec] ss:$16 sps:$4 sm:$0xff]  }
  0x70   :  { %v3212_v22 = vld [vmem:[#allocation5 + $0x484] ss:$16 sps:$4 sm:$0xff]   ;;  %v3210_v24 = vld [vmem:[#allocation5 + $0x480] ss:$16 sps:$4 sm:$0xff]  }
  0x71   :  { %1686 = vmatpush1.bf16.msra.mxu1 %v3144_v38  ;;  %v3218_v26 = vld [vmem:[#allocation5 + $0x4a4] ss:$16 sps:$4 sm:$0xff]   ;;  %v3216_v28 = vld [vmem:[#allocation5 + $0x4a0] ss:$16 sps:$4 sm:$0xff]  }
  0x72   :  { %1727 = vmatpush1.bf16.msra.mxu0 %v3145_v39  ;;  %1687 = vmatprep.subr.bf16.mxu1 %v3146_v40  ;;  %v3224_v30 = vld [vmem:[#allocation5 + $0x4c4] ss:$16 sps:$4 sm:$0xff]   ;;  %v3222_v33 = vld [vmem:[#allocation5 + $0x4c0] ss:$16 sps:$4 sm:$0xff]   ;;  %v3231_v39 = vld [vmem:[#allocation5 + $0xe8] ss:$16 sps:$4 sm:$0xff]  }
  0x73   :  { %1728 = vmatprep.subr.bf16.mxu0 %v3148_v41  ;;  %v3810_v32 = vld [vmem:[#allocation2 + $0x10] sm:$0xff]  ;;  %v3239_v41 = vld [vmem:[#allocation5 + $0x10c] ss:$16 sps:$4 sm:$0xff]  }
  0x74   :  { %v3814_v34 = vcombine.high %v3810_v32, %v3810_v32  ;;  %v3230_v36 = vld [vmem:[#allocation5 + $0x4e4] ss:$16 sps:$4 sm:$0xff]   ;;  %v3228_v38 = vld [vmem:[#allocation5 + $0x4e0] ss:$16 sps:$4 sm:$0xff]  }
  0x75   :  { %1688 = vmatpush1.bf16.msra.mxu1 %v3150_v42  ;;  %v3236_v40 = vld [vmem:[#allocation5 + $0x504] ss:$16 sps:$4 sm:$0xff]   ;;  %v3234_v42 = vld [vmem:[#allocation5 + $0x500] ss:$16 sps:$4 sm:$0xff]  }
  0x76   :  { %1729 = vmatpush1.bf16.msra.mxu0 %v3151_v43  ;;  %1689 = vmatprep.subr.bf16.mxu1 %v3152_v44  ;;  %v3237_v43 = vld [vmem:[#allocation5 + $0x108] ss:$16 sps:$4 sm:$0xff]   ;;  %v3242_v44 = vld [vmem:[#allocation5 + $0x524] ss:$16 sps:$4 sm:$0xff]   ;;  %v3240_v46 = vld [vmem:[#allocation5 + $0x520] ss:$16 sps:$4 sm:$0xff]  }
  0x77   :  { %1730 = vmatprep.subr.bf16.mxu0 %v3154_v45  ;;  %v3245_v45 = vld [vmem:[#allocation5 + $0x12c] ss:$16 sps:$4 sm:$0xff]   ;;  %v3248_v48 = vld [vmem:[#allocation5 + $0x544] ss:$16 sps:$4 sm:$0xff]  }
  0x79   :  { %1690 = vmatpush1.bf16.msra.mxu1 %v3156_v49  ;;  %v3251_v49 = vld [vmem:[#allocation5 + $0x14c] ss:$16 sps:$4 sm:$0xff]  }
  0x7a   :  { %1731 = vmatpush1.bf16.msra.mxu0 %v3157_v50  ;;  %1691 = vmatprep.subr.bf16.mxu1 %v3158_v52  ;;  %v3246_v50 = vld [vmem:[#allocation5 + $0x540] ss:$16 sps:$4 sm:$0xff]   ;;  %v3249_v52 = vld [vmem:[#allocation5 + $0x148] ss:$16 sps:$4 sm:$0xff]  }
  0x7b   :  { %1732 = vmatprep.subr.bf16.mxu0 %v3160_v53  ;;  %v3254_v53 = vld [vmem:[#allocation5 + $0x564] ss:$16 sps:$4 sm:$0xff]  }
  0x7d   :  { %1692 = vmatpush1.bf16.msra.mxu1 %v3162_v54  ;;  %v3257_v54 = vld [vmem:[#allocation5 + $0x16c] ss:$16 sps:$4 sm:$0xff]  }
  0x7e   :  { %1733 = vmatpush1.bf16.msra.mxu0 %v3163_v55  ;;  %1693 = vmatprep.subr.bf16.mxu1 %v3164_v56  ;;  %v3252_v55 = vld [vmem:[#allocation5 + $0x560] ss:$16 sps:$4 sm:$0xff]   ;;  %v3255_v56 = vld [vmem:[#allocation5 + $0x168] ss:$16 sps:$4 sm:$0xff]  }
  0x7f   :  { %1734 = vmatprep.subr.bf16.mxu0 %v3166_v57  ;;  %v3260_v57 = vld [vmem:[#allocation5 + $0x584] ss:$16 sps:$4 sm:$0xff]  }
  0x81   :  { %1694 = vmatpush1.bf16.msra.mxu1 %v3168_v58  ;;  %v3263_v58 = vld [vmem:[#allocation5 + $0x18c] ss:$16 sps:$4 sm:$0xff]  }
  0x82   :  { %1735 = vmatpush1.bf16.msra.mxu0 %v3169_v59  ;;  %1695 = vmatprep.subr.bf16.mxu1 %v3170_v60  ;;  %v3258_v59 = vld [vmem:[#allocation5 + $0x580] ss:$16 sps:$4 sm:$0xff]   ;;  %v3261_v60 = vld [vmem:[#allocation5 + $0x188] ss:$16 sps:$4 sm:$0xff]  }
  0x83   :  { %1736 = vmatprep.subr.bf16.mxu0 %v3172_v61  ;;  %v3266_v61 = vld [vmem:[#allocation5 + $0x5a4] ss:$16 sps:$4 sm:$0xff]  }
  0x85   :  { %1696 = vmatpush1.bf16.msra.mxu1 %v3174_v62  ;;  %v3269_v62 = vld [vmem:[#allocation5 + $0x1ac] ss:$16 sps:$4 sm:$0xff]  }
  0x86   :  { %1737 = vmatpush1.bf16.msra.mxu0 %v3175_v63  ;;  %1697 = vmatprep.subr.bf16.mxu1 %v3176_v0  ;;  %v3264_v63 = vld [vmem:[#allocation5 + $0x5a0] ss:$16 sps:$4 sm:$0xff]   ;;  %v3267_v0 = vld [vmem:[#allocation5 + $0x1a8] ss:$16 sps:$4 sm:$0xff]  }
  0x87   :  { %1738 = vmatprep.subr.bf16.mxu0 %v3178_v1  ;;  %v3272_v1 = vld [vmem:[#allocation5 + $0x5c4] ss:$16 sps:$4 sm:$0xff]  }
  0x89   :  { %1698 = vmatpush1.bf16.msra.mxu1 %v3180_v2  ;;  %v3275_v2 = vld [vmem:[#allocation5 + $0x1cc] ss:$16 sps:$4 sm:$0xff]  }
  0x8a   :  { %1739 = vmatpush1.bf16.msra.mxu0 %v3181_v3  ;;  %1831 = vmatprep.subr.bf16.mxu1 %v3191_v5  ;;  %v3270_v3 = vld [vmem:[#allocation5 + $0x5c0] ss:$16 sps:$4 sm:$0xff]   ;;  %v3278_v5 = vld [vmem:[#allocation5 + $0x5e4] ss:$16 sps:$4 sm:$0xff]  }
  0x8b   :  { %1749 = vmatprep.subr.bf16.mxu0 %v3188_v4  ;;  %v3273_v4 = vld [vmem:[#allocation5 + $0x1c8] ss:$16 sps:$4 sm:$0xff]  }
  0x8c   :  { %1700 = vmatmul.mubr.bf16.vlgmr.msra.gmra.mrb[0].mxu1 %v3803_v6 }
  0x8d   :  { %1741 = vmatmul.mubr.bf16.vlgmr.msra.gmra.mrb[0].mxu0 %v3805_v7  ;;  %1832 = vmatpush1.bf16.msra.mxu1 %v3189_v9  ;;  %v3276_v9 = vld [vmem:[#allocation5 + $0x5e0] ss:$16 sps:$4 sm:$0xff]  }
  0x8e   :  { %1750 = vmatpush1.bf16.msra.mxu0 %v3186_v8  ;;  %1833 = vmatprep.subr.bf16.mxu1 %v3197_v11  ;;  %v3281_v8 = vld [vmem:[#allocation5 + $0x1ec] ss:$16 sps:$4 sm:$0xff]   ;;  %v3286_v11 = vld [vmem:[#allocation5 + $0x604] ss:$16 sps:$4 sm:$0xff]  }
  0x8f   :  { %1751 = vmatprep.subr.bf16.mxu0 %v3194_v10  ;;  %1863 = vmatprep.mubr.bf16.mxu1 %v3797_v47  ;;  %v3243_v47 = vld [vmem:[#allocation5 + $0x128] ss:$16 sps:$4 sm:$0xff]  }
  0x90   :  { %1781 = vmatprep.mubr.bf16.mxu0 %v3814_v34  ;;  %v3279_v10 = vld [vmem:[#allocation5 + $0x1e8] ss:$16 sps:$4 sm:$0xff]  }
  0x91   :  { %1834 = vmatpush1.bf16.msra.mxu1 %v3195_v13  ;;  %v3819_v13 = vcombine.low %v3810_v32, %v3810_v32  ;;  %v3311_v32 = vld [vmem:[#allocation5 + $0x288] ss:$16 sps:$4 sm:$0xff]  }
  0x92   :  { %1752 = vmatpush1.bf16.msra.mxu0 %v3192_v12  ;;  %1835 = vmatprep.subr.bf16.mxu1 %v3203_v15  ;;  %v3289_v12 = vld [vmem:[#allocation5 + $0x20c] ss:$16 sps:$4 sm:$0xff]   ;;  %v3287_v15 = vld [vmem:[#allocation5 + $0x208] ss:$16 sps:$4 sm:$0xff]  }
  0x93   :  { %1753 = vmatprep.subr.bf16.mxu0 %v3200_v14  ;;  %v3284_v14 = vld [vmem:[#allocation5 + $0x600] ss:$16 sps:$4 sm:$0xff]  }
  0x95   :  { %1836 = vmatpush1.bf16.msra.mxu1 %v3201_v17  ;;  %v3295_v17 = vld [vmem:[#allocation5 + $0x22c] ss:$16 sps:$4 sm:$0xff]  }
  0x96   :  { %1754 = vmatpush1.bf16.msra.mxu0 %v3198_v16  ;;  %1837 = vmatprep.subr.bf16.mxu1 %v3209_v19  ;;  %v3292_v16 = vld [vmem:[#allocation5 + $0x624] ss:$16 sps:$4 sm:$0xff]  }
  0x97   :  { %1755 = vmatprep.subr.bf16.mxu0 %v3206_v18  ;;  %v3821_v18 = vld [vmem:[#allocation2 + $0x18] sm:$0xff] }
  0x98   :  { %v3825_v19 = vcombine.high %v3821_v18, %v3821_v18 }
  0x99   :  { %1838 = vmatpush1.bf16.msra.mxu1 %v3207_v21  ;;  %v3293_v21 = vld [vmem:[#allocation5 + $0x228] ss:$16 sps:$4 sm:$0xff]  }
  0x9a   :  { %1756 = vmatpush1.bf16.msra.mxu0 %v3204_v20  ;;  %1839 = vmatprep.subr.bf16.mxu1 %v3215_v23  ;;  %v3290_v20 = vld [vmem:[#allocation5 + $0x620] ss:$16 sps:$4 sm:$0xff]   ;;  %v3301_v23 = vld [vmem:[#allocation5 + $0x24c] ss:$16 sps:$4 sm:$0xff]  }
  0x9b   :  { %1757 = vmatprep.subr.bf16.mxu0 %v3212_v22  ;;  %v3298_v22 = vld [vmem:[#allocation5 + $0x644] ss:$16 sps:$4 sm:$0xff]  }
  0x9d   :  { %1840 = vmatpush1.bf16.msra.mxu1 %v3213_v25  ;;  %v3299_v25 = vld [vmem:[#allocation5 + $0x248] ss:$16 sps:$4 sm:$0xff]  }
  0x9e   :  { %1758 = vmatpush1.bf16.msra.mxu0 %v3210_v24  ;;  %1841 = vmatprep.subr.bf16.mxu1 %v3221_v27  ;;  %v3296_v24 = vld [vmem:[#allocation5 + $0x640] ss:$16 sps:$4 sm:$0xff]  }
  0x9f   :  { %1759 = vmatprep.subr.bf16.mxu0 %v3218_v26  ;;  %v3304_v26 = vld [vmem:[#allocation5 + $0x664] ss:$16 sps:$4 sm:$0xff]   ;;  %v3302_v27 = vld [vmem:[#allocation5 + $0x660] ss:$16 sps:$4 sm:$0xff]  }
  0xa1   :  { %1842 = vmatpush1.bf16.msra.mxu1 %v3219_v29  ;;  %v3310_v29 = vld [vmem:[#allocation5 + $0x684] ss:$16 sps:$4 sm:$0xff]  }
  0xa2   :  { %1760 = vmatpush1.bf16.msra.mxu0 %v3216_v28  ;;  %1843 = vmatprep.subr.bf16.mxu1 %v3227_v31  ;;  %v3305_v28 = vld [vmem:[#allocation5 + $0x268] ss:$16 sps:$4 sm:$0xff]   ;;  %v3308_v31 = vld [vmem:[#allocation5 + $0x680] ss:$16 sps:$4 sm:$0xff]  }
  0xa3   :  { %1761 = vmatprep.subr.bf16.mxu0 %v3224_v30  ;;  %v3313_v30 = vld [vmem:[#allocation5 + $0x28c] ss:$16 sps:$4 sm:$0xff]  }
  0xa5   :  { %1844 = vmatpush1.bf16.msra.mxu1 %v3225_v35  ;;  %v3314_v35 = vld [vmem:[#allocation5 + $0x6a0] ss:$16 sps:$4 sm:$0xff]  }
  0xa6   :  { %1762 = vmatpush1.bf16.msra.mxu0 %v3222_v33  ;;  %1845 = vmatprep.subr.bf16.mxu1 %v3233_v37  ;;  %v3319_v33 = vld [vmem:[#allocation5 + $0x2ac] ss:$16 sps:$4 sm:$0xff]   ;;  %v3322_v37 = vld [vmem:[#allocation5 + $0x6c4] ss:$16 sps:$4 sm:$0xff]  }
  0xa7   :  { %1763 = vmatprep.subr.bf16.mxu0 %v3230_v36  ;;  %v3317_v36 = vld [vmem:[#allocation5 + $0x2a8] ss:$16 sps:$4 sm:$0xff]  }
  0xa9   :  { %1846 = vmatpush1.bf16.msra.mxu1 %v3231_v39  ;;  %v3320_v39 = vld [vmem:[#allocation5 + $0x6c0] ss:$16 sps:$4 sm:$0xff]  }
  0xaa   :  { %1764 = vmatpush1.bf16.msra.mxu0 %v3228_v38  ;;  %1847 = vmatprep.subr.bf16.mxu1 %v3239_v41  ;;  %v3325_v38 = vld [vmem:[#allocation5 + $0x2cc] ss:$16 sps:$4 sm:$0xff]   ;;  %v3328_v41 = vld [vmem:[#allocation5 + $0x6e4] ss:$16 sps:$4 sm:$0xff]  }
  0xab   :  { %1765 = vmatprep.subr.bf16.mxu0 %v3236_v40  ;;  %v3323_v40 = vld [vmem:[#allocation5 + $0x2c8] ss:$16 sps:$4 sm:$0xff]  }
  0xad   :  { %1848 = vmatpush1.bf16.msra.mxu1 %v3237_v43  ;;  %v3326_v43 = vld [vmem:[#allocation5 + $0x6e0] ss:$16 sps:$4 sm:$0xff]  }
  0xae   :  { %1766 = vmatpush1.bf16.msra.mxu0 %v3234_v42  ;;  %1849 = vmatprep.subr.bf16.mxu1 %v3245_v45  ;;  %v3331_v42 = vld [vmem:[#allocation5 + $0x2ec] ss:$16 sps:$4 sm:$0xff]   ;;  %v3334_v45 = vld [vmem:[#allocation5 + $0x704] ss:$16 sps:$4 sm:$0xff]  }
  0xaf   :  { %1767 = vmatprep.subr.bf16.mxu0 %v3242_v44  ;;  %v3329_v44 = vld [vmem:[#allocation5 + $0x2e8] ss:$16 sps:$4 sm:$0xff]  }
  0xb1   :  { %1850 = vmatpush1.bf16.msra.mxu1 %v3243_v47  ;;  %v3332_v47 = vld [vmem:[#allocation5 + $0x700] ss:$16 sps:$4 sm:$0xff]  }
  0xb2   :  { %1768 = vmatpush1.bf16.msra.mxu0 %v3240_v46  ;;  %1851 = vmatprep.subr.bf16.mxu1 %v3251_v49  ;;  %v3337_v46 = vld [vmem:[#allocation5 + $0x30c] ss:$16 sps:$4 sm:$0xff]   ;;  %v3340_v49 = vld [vmem:[#allocation5 + $0x724] ss:$16 sps:$4 sm:$0xff]  }
  0xb3   :  { %1769 = vmatprep.subr.bf16.mxu0 %v3248_v48  ;;  %v3335_v48 = vld [vmem:[#allocation5 + $0x308] ss:$16 sps:$4 sm:$0xff]  }
  0xb5   :  { %1852 = vmatpush1.bf16.msra.mxu1 %v3249_v52  ;;  %v3338_v52 = vld [vmem:[#allocation5 + $0x720] ss:$16 sps:$4 sm:$0xff]  }
  0xb6   :  { %1770 = vmatpush1.bf16.msra.mxu0 %v3246_v50  ;;  %1853 = vmatprep.subr.bf16.mxu1 %v3257_v54  ;;  %v3343_v50 = vld [vmem:[#allocation5 + $0x32c] ss:$16 sps:$4 sm:$0xff]   ;;  %v3346_v54 = vld [vmem:[#allocation5 + $0x744] ss:$16 sps:$4 sm:$0xff]  }
  0xb7   :  { %1771 = vmatprep.subr.bf16.mxu0 %v3254_v53  ;;  %v3341_v53 = vld [vmem:[#allocation5 + $0x328] ss:$16 sps:$4 sm:$0xff]  }
  0xb9   :  { %1854 = vmatpush1.bf16.msra.mxu1 %v3255_v56  ;;  %v3344_v56 = vld [vmem:[#allocation5 + $0x740] ss:$16 sps:$4 sm:$0xff]  }
  0xba   :  { %1772 = vmatpush1.bf16.msra.mxu0 %v3252_v55  ;;  %1855 = vmatprep.subr.bf16.mxu1 %v3263_v58  ;;  %v3349_v55 = vld [vmem:[#allocation5 + $0x34c] ss:$16 sps:$4 sm:$0xff]   ;;  %v3352_v58 = vld [vmem:[#allocation5 + $0x764] ss:$16 sps:$4 sm:$0xff]  }
  0xbb   :  { %1773 = vmatprep.subr.bf16.mxu0 %v3260_v57  ;;  %v3347_v57 = vld [vmem:[#allocation5 + $0x348] ss:$16 sps:$4 sm:$0xff]  }
  0xbd   :  { %1856 = vmatpush1.bf16.msra.mxu1 %v3261_v60  ;;  %v3350_v60 = vld [vmem:[#allocation5 + $0x760] ss:$16 sps:$4 sm:$0xff]  }
  0xbe   :  { %1774 = vmatpush1.bf16.msra.mxu0 %v3258_v59  ;;  %1857 = vmatprep.subr.bf16.mxu1 %v3269_v62  ;;  %v3355_v59 = vld [vmem:[#allocation5 + $0x36c] ss:$16 sps:$4 sm:$0xff]   ;;  %v3358_v62 = vld [vmem:[#allocation5 + $0x784] ss:$16 sps:$4 sm:$0xff]  }
  0xbf   :  { %1775 = vmatprep.subr.bf16.mxu0 %v3266_v61  ;;  %v3353_v61 = vld [vmem:[#allocation5 + $0x368] ss:$16 sps:$4 sm:$0xff]  }
  0xc1   :  { %1858 = vmatpush1.bf16.msra.mxu1 %v3267_v0  ;;  %v3356_v0 = vld [vmem:[#allocation5 + $0x780] ss:$16 sps:$4 sm:$0xff]  }
  0xc2   :  { %1776 = vmatpush1.bf16.msra.mxu0 %v3264_v63  ;;  %1859 = vmatprep.subr.bf16.mxu1 %v3275_v2  ;;  %v3361_v63 = vld [vmem:[#allocation5 + $0x38c] ss:$16 sps:$4 sm:$0xff]   ;;  %v3364_v2 = vld [vmem:[#allocation5 + $0x7a4] ss:$16 sps:$4 sm:$0xff]  }
  0xc3   :  { %1777 = vmatprep.subr.bf16.mxu0 %v3272_v1  ;;  %v3359_v1 = vld [vmem:[#allocation5 + $0x388] ss:$16 sps:$4 sm:$0xff]  }
  0xc5   :  { %1860 = vmatpush1.bf16.msra.mxu1 %v3273_v4  ;;  %v3362_v4 = vld [vmem:[#allocation5 + $0x7a0] ss:$16 sps:$4 sm:$0xff]  }
  0xc6   :  { %1778 = vmatpush1.bf16.msra.mxu0 %v3270_v3  ;;  %1861 = vmatprep.subr.bf16.mxu1 %v3281_v8  ;;  %v3367_v3 = vld [vmem:[#allocation5 + $0x3ac] ss:$16 sps:$4 sm:$0xff]   ;;  %v3370_v8 = vld [vmem:[#allocation5 + $0x7c4] ss:$16 sps:$4 sm:$0xff]  }
  0xc7   :  { %1779 = vmatprep.subr.bf16.mxu0 %v3278_v5  ;;  %v3365_v5 = vld [vmem:[#allocation5 + $0x3a8] ss:$16 sps:$4 sm:$0xff]  }
  0xc9   :  { %1862 = vmatpush1.bf16.msra.mxu1 %v3279_v10  ;;  %v3368_v10 = vld [vmem:[#allocation5 + $0x7c0] ss:$16 sps:$4 sm:$0xff]  }
  0xca   :  { %1780 = vmatpush1.bf16.msra.mxu0 %v3276_v9  ;;  %1872 = vmatprep.subr.bf16.mxu1 %v3289_v12  ;;  %v3373_v9 = vld [vmem:[#allocation5 + $0x3cc] ss:$16 sps:$4 sm:$0xff]   ;;  %v3376_v12 = vld [vmem:[#allocation5 + $0x7e4] ss:$16 sps:$4 sm:$0xff]  }
  0xcb   :  { %1790 = vmatprep.subr.bf16.mxu0 %v3286_v11  ;;  %v3371_v11 = vld [vmem:[#allocation5 + $0x3c8] ss:$16 sps:$4 sm:$0xff]  }
  0xcc   :  { %1864 = vmatmul.mubr.bf16.vlgmr.msra.gmra.mrb[4].mxu1 %v3803_v6  ;;  %v3307_v6 = vld [vmem:[#allocation5 + $0x26c] ss:$16 sps:$4 sm:$0xff]  }
  0xcd   :  { %1782 = vmatmul.mubr.bf16.vlgmr.msra.gmra.mrb[0].mxu0 %v3819_v13  ;;  %1873 = vmatpush1.bf16.msra.mxu1 %v3287_v15  ;;  %v3374_v15 = vld [vmem:[#allocation5 + $0x7e0] ss:$16 sps:$4 sm:$0xff]  }
  0xce   :  { %1791 = vmatpush1.bf16.msra.mxu0 %v3284_v14  ;;  %1874 = vmatprep.subr.bf16.mxu1 %v3295_v17  ;;  %v3379_v14 = vld [vmem:[#allocation5 + $0x3ec] ss:$16 sps:$4 sm:$0xff]  }
  0xcf   :  { %1792 = vmatprep.subr.bf16.mxu0 %v3292_v16  ;;  %1822 = vmatprep.mubr.bf16.mxu0 %v3825_v19  ;;  %v3377_v16 = vld [vmem:[#allocation5 + $0x3e8] ss:$16 sps:$4 sm:$0xff]   ;;  %v3384_v17 = vld [vmem:[#allocation5 + $0x40c] ss:$16 sps:$4 sm:$0xff]  }
  0xd0   :  { %1904 = vmatprep.mubr.bf16.mxu1 %v3799_v51  ;;  %v3316_v51 = vld [vmem:[#allocation5 + $0x6a4] ss:$16 sps:$4 sm:$0xff]  }
  0xd1   :  { %1875 = vmatpush1.bf16.msra.mxu1 %v3293_v21  ;;  %v3833_v21 = vcombine.low %v3821_v18, %v3821_v18  ;;  %v3481_v18 = vld [vmem:[#allocation7 + $0x10] ss:$8 sps:$4 sm:$0xff]  }
  0xd2   :  { %1793 = vmatpush1.bf16.msra.mxu0 %v3290_v20  ;;  %1876 = vmatprep.subr.bf16.mxu1 %v3301_v23  ;;  %v3382_v20 = vld [vmem:[#allocation5 + $0x408] ss:$16 sps:$4 sm:$0xff]  }
  0xd3   :  { %1794 = vmatprep.subr.bf16.mxu0 %v3298_v22  ;;  %v3387_v22 = vld [vmem:[#allocation5 + $0x42c] ss:$16 sps:$4 sm:$0xff]   ;;  %v3478_v23 = vld [vmem:[#allocation7] ss:$8 sps:$4 sm:$0xff]  }
  0xd5   :  { %1877 = vmatpush1.bf16.msra.mxu1 %v3299_v25  ;;  %v3385_v25 = vld [vmem:[#allocation5 + $0x428] ss:$16 sps:$4 sm:$0xff]  }
  0xd6   :  { %1795 = vmatpush1.bf16.msra.mxu0 %v3296_v24  ;;  %1878 = vmatprep.subr.bf16.mxu1 %v3307_v6  ;;  %v3480_v24 = vld [vmem:[#allocation7 + $0x4] ss:$8 sps:$4 sm:$0xff]  }
  0xd7   :  { %1796 = vmatprep.subr.bf16.mxu0 %v3304_v26  ;;  %v3483_v26 = vld [vmem:[#allocation7 + $0x14] ss:$8 sps:$4 sm:$0xff]  }
  0xd8   :  { %v3390_v6 = vld [vmem:[#allocation5 + $0x44c] ss:$16 sps:$4 sm:$0xff]  }
  0xd9   :  { %1879 = vmatpush1.bf16.msra.mxu1 %v3305_v28  ;;  %v3388_v28 = vld [vmem:[#allocation5 + $0x448] ss:$16 sps:$4 sm:$0xff]  }
  0xda   :  { %1797 = vmatpush1.bf16.msra.mxu0 %v3302_v27  ;;  %1880 = vmatprep.subr.bf16.mxu1 %v3313_v30  ;;  %v3486_v27 = vld [vmem:[#allocation7 + $0x24] ss:$8 sps:$4 sm:$0xff]   ;;  %v3391_v30 = vld [vmem:[#allocation5 + $0x468] ss:$16 sps:$4 sm:$0xff]  }
  0xdb   :  { %1798 = vmatprep.subr.bf16.mxu0 %v3310_v29  ;;  %v3393_v29 = vld [vmem:[#allocation5 + $0x46c] ss:$16 sps:$4 sm:$0xff]  }
  0xdd   :  { %1881 = vmatpush1.bf16.msra.mxu1 %v3311_v32  ;;  %v3489_v32 = vld [vmem:[#allocation7 + $0x34] ss:$8 sps:$4 sm:$0xff]  }
  0xde   :  { %1799 = vmatpush1.bf16.msra.mxu0 %v3308_v31  ;;  %1882 = vmatprep.subr.bf16.mxu1 %v3319_v33  ;;  %v3396_v31 = vld [vmem:[#allocation5 + $0x48c] ss:$16 sps:$4 sm:$0xff]   ;;  %v3394_v33 = vld [vmem:[#allocation5 + $0x488] ss:$16 sps:$4 sm:$0xff]  }
  0xdf   :  { %1800 = vmatprep.subr.bf16.mxu0 %v3316_v51  ;;  %v3492_v51 = vld [vmem:[#allocation7 + $0x44] ss:$8 sps:$4 sm:$0xff]  }
  0xe1   :  { %1883 = vmatpush1.bf16.msra.mxu1 %v3317_v36  ;;  %v3490_v36 = vld [vmem:[#allocation7 + $0x40] ss:$8 sps:$4 sm:$0xff]  }
  0xe2   :  { %1801 = vmatpush1.bf16.msra.mxu0 %v3314_v35  ;;  %1884 = vmatprep.subr.bf16.mxu1 %v3325_v38  ;;  %v3399_v35 = vld [vmem:[#allocation5 + $0x4ac] ss:$16 sps:$4 sm:$0xff]   ;;  %v3397_v38 = vld [vmem:[#allocation5 + $0x4a8] ss:$16 sps:$4 sm:$0xff]  }
  0xe3   :  { %1802 = vmatprep.subr.bf16.mxu0 %v3322_v37  ;;  %v3495_v37 = vld [vmem:[#allocation7 + $0x54] ss:$8 sps:$4 sm:$0xff]  }
  0xe5   :  { %1885 = vmatpush1.bf16.msra.mxu1 %v3323_v40  ;;  %v3493_v40 = vld [vmem:[#allocation7 + $0x50] ss:$8 sps:$4 sm:$0xff]  }
  0xe6   :  { %1803 = vmatpush1.bf16.msra.mxu0 %v3320_v39  ;;  %1886 = vmatprep.subr.bf16.mxu1 %v3331_v42  ;;  %v3402_v39 = vld [vmem:[#allocation5 + $0x4cc] ss:$16 sps:$4 sm:$0xff]   ;;  %v3400_v42 = vld [vmem:[#allocation5 + $0x4c8] ss:$16 sps:$4 sm:$0xff]  }
  0xe7   :  { %1804 = vmatprep.subr.bf16.mxu0 %v3328_v41  ;;  %v3498_v41 = vld [vmem:[#allocation7 + $0x64] ss:$8 sps:$4 sm:$0xff]  }
  0xe9   :  { %1887 = vmatpush1.bf16.msra.mxu1 %v3329_v44  ;;  %v3496_v44 = vld [vmem:[#allocation7 + $0x60] ss:$8 sps:$4 sm:$0xff]  }
  0xea   :  { %1805 = vmatpush1.bf16.msra.mxu0 %v3326_v43  ;;  %1888 = vmatprep.subr.bf16.mxu1 %v3337_v46  ;;  %v3405_v43 = vld [vmem:[#allocation5 + $0x4ec] ss:$16 sps:$4 sm:$0xff]   ;;  %v3403_v46 = vld [vmem:[#allocation5 + $0x4e8] ss:$16 sps:$4 sm:$0xff]  }
  0xeb   :  { %1806 = vmatprep.subr.bf16.mxu0 %v3334_v45  ;;  %v3501_v45 = vld [vmem:[#allocation7 + $0x74] ss:$8 sps:$4 sm:$0xff]  }
  0xed   :  { %1889 = vmatpush1.bf16.msra.mxu1 %v3335_v48  ;;  %v3499_v48 = vld [vmem:[#allocation7 + $0x70] ss:$8 sps:$4 sm:$0xff]  }
  0xee   :  { %1807 = vmatpush1.bf16.msra.mxu0 %v3332_v47  ;;  %1890 = vmatprep.subr.bf16.mxu1 %v3343_v50  ;;  %v3408_v47 = vld [vmem:[#allocation5 + $0x50c] ss:$16 sps:$4 sm:$0xff]   ;;  %v3406_v50 = vld [vmem:[#allocation5 + $0x508] ss:$16 sps:$4 sm:$0xff]  }
  0xef   :  { %1808 = vmatprep.subr.bf16.mxu0 %v3340_v49  ;;  %v3504_v49 = vld [vmem:[#allocation7 + $0x84] ss:$8 sps:$4 sm:$0xff]  }
  0xf1   :  { %1891 = vmatpush1.bf16.msra.mxu1 %v3341_v53  ;;  %v3502_v53 = vld [vmem:[#allocation7 + $0x80] ss:$8 sps:$4 sm:$0xff]  }
  0xf2   :  { %1809 = vmatpush1.bf16.msra.mxu0 %v3338_v52  ;;  %1892 = vmatprep.subr.bf16.mxu1 %v3349_v55  ;;  %v3411_v52 = vld [vmem:[#allocation5 + $0x52c] ss:$16 sps:$4 sm:$0xff]   ;;  %v3409_v55 = vld [vmem:[#allocation5 + $0x528] ss:$16 sps:$4 sm:$0xff]  }
  0xf3   :  { %1810 = vmatprep.subr.bf16.mxu0 %v3346_v54  ;;  %v3507_v54 = vld [vmem:[#allocation7 + $0x94] ss:$8 sps:$4 sm:$0xff]  }
  0xf5   :  { %1893 = vmatpush1.bf16.msra.mxu1 %v3347_v57  ;;  %v3505_v57 = vld [vmem:[#allocation7 + $0x90] ss:$8 sps:$4 sm:$0xff]  }
  0xf6   :  { %1811 = vmatpush1.bf16.msra.mxu0 %v3344_v56  ;;  %1894 = vmatprep.subr.bf16.mxu1 %v3355_v59  ;;  %v3414_v56 = vld [vmem:[#allocation5 + $0x54c] ss:$16 sps:$4 sm:$0xff]   ;;  %v3412_v59 = vld [vmem:[#allocation5 + $0x548] ss:$16 sps:$4 sm:$0xff]  }
  0xf7   :  { %1812 = vmatprep.subr.bf16.mxu0 %v3352_v58  ;;  %v3510_v58 = vld [vmem:[#allocation7 + $0xa4] ss:$8 sps:$4 sm:$0xff]  }
  0xf9   :  { %1895 = vmatpush1.bf16.msra.mxu1 %v3353_v61  ;;  %v3508_v61 = vld [vmem:[#allocation7 + $0xa0] ss:$8 sps:$4 sm:$0xff]  }
  0xfa   :  { %1813 = vmatpush1.bf16.msra.mxu0 %v3350_v60  ;;  %1896 = vmatprep.subr.bf16.mxu1 %v3361_v63  ;;  %v3417_v60 = vld [vmem:[#allocation5 + $0x56c] ss:$16 sps:$4 sm:$0xff]   ;;  %v3415_v63 = vld [vmem:[#allocation5 + $0x568] ss:$16 sps:$4 sm:$0xff]  }
  0xfb   :  { %1814 = vmatprep.subr.bf16.mxu0 %v3358_v62  ;;  %v3513_v62 = vld [vmem:[#allocation7 + $0xb4] ss:$8 sps:$4 sm:$0xff]  }
  0xfd   :  { %1897 = vmatpush1.bf16.msra.mxu1 %v3359_v1  ;;  %v3511_v1 = vld [vmem:[#allocation7 + $0xb0] ss:$8 sps:$4 sm:$0xff]  }
  0xfe   :  { %1815 = vmatpush1.bf16.msra.mxu0 %v3356_v0  ;;  %1898 = vmatprep.subr.bf16.mxu1 %v3367_v3  ;;  %v3420_v0 = vld [vmem:[#allocation5 + $0x58c] ss:$16 sps:$4 sm:$0xff]   ;;  %v3418_v3 = vld [vmem:[#allocation5 + $0x588] ss:$16 sps:$4 sm:$0xff]  }
  0xff   :  { %1816 = vmatprep.subr.bf16.mxu0 %v3364_v2  ;;  %v3516_v2 = vld [vmem:[#allocation7 + $0xc4] ss:$8 sps:$4 sm:$0xff]  }
 0x101   :  { %1899 = vmatpush1.bf16.msra.mxu1 %v3365_v5  ;;  %v3514_v5 = vld [vmem:[#allocation7 + $0xc0] ss:$8 sps:$4 sm:$0xff]  }
 0x102   :  { %1817 = vmatpush1.bf16.msra.mxu0 %v3362_v4  ;;  %1900 = vmatprep.subr.bf16.mxu1 %v3373_v9  ;;  %v3423_v4 = vld [vmem:[#allocation5 + $0x5ac] ss:$16 sps:$4 sm:$0xff]   ;;  %v3421_v9 = vld [vmem:[#allocation5 + $0x5a8] ss:$16 sps:$4 sm:$0xff]  }
 0x103   :  { %1818 = vmatprep.subr.bf16.mxu0 %v3370_v8  ;;  %v3519_v8 = vld [vmem:[#allocation7 + $0xd4] ss:$8 sps:$4 sm:$0xff]  }
 0x105   :  { %1901 = vmatpush1.bf16.msra.mxu1 %v3371_v11  ;;  %v3517_v11 = vld [vmem:[#allocation7 + $0xd0] ss:$8 sps:$4 sm:$0xff]  }
 0x106   :  { %1819 = vmatpush1.bf16.msra.mxu0 %v3368_v10  ;;  %1902 = vmatprep.subr.bf16.mxu1 %v3379_v14  ;;  %v3426_v10 = vld [vmem:[#allocation5 + $0x5cc] ss:$16 sps:$4 sm:$0xff]  }
 0x107   :  { %1820 = vmatprep.subr.bf16.mxu0 %v3376_v12  ;;  %v3424_v12 = vld [vmem:[#allocation5 + $0x5c8] ss:$16 sps:$4 sm:$0xff]   ;;  %v3429_v14 = vld [vmem:[#allocation5 + $0x5ec] ss:$16 sps:$4 sm:$0xff]  }
 0x109   :  { %1903 = vmatpush1.bf16.msra.mxu1 %v3377_v16  ;;  %v3432_v16 = vld [vmem:[#allocation5 + $0x60c] ss:$16 sps:$4 sm:$0xff]  }
 0x10a   :  { %1821 = vmatpush1.bf16.msra.mxu0 %v3374_v15  ;;  %1913 = vmatprep.subr.bf16.mxu1 %v3384_v17  ;;  %v3427_v15 = vld [vmem:[#allocation5 + $0x5e8] ss:$16 sps:$4 sm:$0xff]  }
 0x10b   :  { %2398 = vmatprep.subr.bf16.mxu0 %v3480_v24  ;;  %v3430_v17 = vld [vmem:[#allocation5 + $0x608] ss:$16 sps:$4 sm:$0xff]  }
 0x10c   :  { %1905 = vmatmul.mubr.bf16.vlgmr.msra.gmra.mrb[4].mxu1 %v3805_v7  ;;  %v3484_v7 = vld [vmem:[#allocation7 + $0x20] ss:$8 sps:$4 sm:$0xff]  }
 0x10d   :  { %1823 = vmatmul.mubr.bf16.vlgmr.msra.gmra.mrb[0].mxu0 %v3833_v21  ;;  %1914 = vmatpush1.bf16.msra.mxu1 %v3382_v20  ;;  %v3435_v20 = vld [vmem:[#allocation5 + $0x62c] ss:$16 sps:$4 sm:$0xff]   ;;  %v3436_v24 = vld [vmem:[#allocation5 + $0x648] ss:$16 sps:$4 sm:$0xff]  }
 0x10e   :  { %1945 = vmatprep.mubr.bf16.mxu1 %v3814_v34  ;;  %1915 = vmatprep.subr.bf16.mxu1 %v3387_v22  ;;  %v3487_v34 = vld [vmem:[#allocation7 + $0x30] ss:$8 sps:$4 sm:$0xff]  }
 0x10f   :  { %2399 = vmatpush1.bf16.msra.mxu0 %v3478_v23  ;;  %v3433_v22 = vld [vmem:[#allocation5 + $0x628] ss:$16 sps:$4 sm:$0xff]   ;;  %v3438_v23 = vld [vmem:[#allocation5 + $0x64c] ss:$16 sps:$4 sm:$0xff]  }
 0x110   :  { %2400 = vmatprep.subr.bf16.mxu0 %v3483_v26  ;;  %v3439_v26 = vld [vmem:[#allocation5 + $0x668] ss:$16 sps:$4 sm:$0xff]  }
 0x111   :  { %1916 = vmatpush1.bf16.msra.mxu1 %v3385_v25  ;;  %v3441_v25 = vld [vmem:[#allocation5 + $0x66c] ss:$16 sps:$4 sm:$0xff]  }
 0x112   :  { %1917 = vmatprep.subr.bf16.mxu1 %v3390_v6  ;;  %v3444_v6 = vld [vmem:[#allocation5 + $0x68c] ss:$16 sps:$4 sm:$0xff]  }
 0x113   :  { %2401 = vmatpush1.bf16.msra.mxu0 %v3481_v18  ;;  %v3442_v18 = vld [vmem:[#allocation5 + $0x688] ss:$16 sps:$4 sm:$0xff]  }
 0x114   :  { %2402 = vmatprep.subr.bf16.mxu0 %v3486_v27  ;;  %v3447_v27 = vld [vmem:[#allocation5 + $0x6ac] ss:$16 sps:$4 sm:$0xff]  }
 0x115   :  { %1918 = vmatpush1.bf16.msra.mxu1 %v3388_v28  ;;  %v3450_v28 = vld [vmem:[#allocation5 + $0x6cc] ss:$16 sps:$4 sm:$0xff]  }
 0x116   :  { %1919 = vmatprep.subr.bf16.mxu1 %v3393_v29  ;;  %v3522_v29 = vld [vmem:[#allocation7 + $0xe4] ss:$8 sps:$4 sm:$0xff]  }
 0x117   :  { %2403 = vmatpush1.bf16.msra.mxu0 %v3484_v7  ;;  %v3520_v7 = vld [vmem:[#allocation7 + $0xe0] ss:$8 sps:$4 sm:$0xff]  }
 0x118   :  { %2404 = vmatprep.subr.bf16.mxu0 %v3489_v32  ;;  %v3448_v32 = vld [vmem:[#allocation5 + $0x6c8] ss:$16 sps:$4 sm:$0xff]  }
 0x119   :  { %1920 = vmatpush1.bf16.msra.mxu1 %v3391_v30 }
 0x11a   :  { %1921 = vmatprep.subr.bf16.mxu1 %v3396_v31 }
 0x11b   :  { %2405 = vmatpush1.bf16.msra.mxu0 %v3487_v34 }
 0x11c   :  { %2406 = vmatprep.subr.bf16.mxu0 %v3492_v51  ;;  %v3453_v51 = vld [vmem:[#allocation5 + $0x6ec] ss:$16 sps:$4 sm:$0xff]  }
 0x11d   :  { %1922 = vmatpush1.bf16.msra.mxu1 %v3394_v33  ;;  %v3525_v33 = vld [vmem:[#allocation7 + $0xf4] ss:$8 sps:$4 sm:$0xff]  }
 0x11e   :  { %1923 = vmatprep.subr.bf16.mxu1 %v3399_v35  ;;  %v3523_v35 = vld [vmem:[#allocation7 + $0xf0] ss:$8 sps:$4 sm:$0xff]  }
 0x11f   :  { %2407 = vmatpush1.bf16.msra.mxu0 %v3490_v36  ;;  %v3451_v36 = vld [vmem:[#allocation5 + $0x6e8] ss:$16 sps:$4 sm:$0xff]  }
 0x120   :  { %2408 = vmatprep.subr.bf16.mxu0 %v3495_v37  ;;  %v3456_v37 = vld [vmem:[#allocation5 + $0x70c] ss:$16 sps:$4 sm:$0xff]  }
 0x121   :  { %1924 = vmatpush1.bf16.msra.mxu1 %v3397_v38  ;;  %v3528_v38 = vld [vmem:[#allocation7 + $0x104] ss:$8 sps:$4 sm:$0xff]  }
 0x122   :  { %1925 = vmatprep.subr.bf16.mxu1 %v3402_v39  ;;  %v3454_v39 = vld [vmem:[#allocation5 + $0x708] ss:$16 sps:$4 sm:$0xff]  }
 0x123   :  { %2409 = vmatpush1.bf16.msra.mxu0 %v3493_v40  ;;  %v3459_v40 = vld [vmem:[#allocation5 + $0x72c] ss:$16 sps:$4 sm:$0xff]  }
 0x124   :  { %2410 = vmatprep.subr.bf16.mxu0 %v3498_v41  ;;  %v3457_v41 = vld [vmem:[#allocation5 + $0x728] ss:$16 sps:$4 sm:$0xff]  }
 0x125   :  { %1926 = vmatpush1.bf16.msra.mxu1 %v3400_v42  ;;  %v3462_v42 = vld [vmem:[#allocation5 + $0x74c] ss:$16 sps:$4 sm:$0xff]  }
 0x126   :  { %1927 = vmatprep.subr.bf16.mxu1 %v3405_v43  ;;  %v3460_v43 = vld [vmem:[#allocation5 + $0x748] ss:$16 sps:$4 sm:$0xff]  }
 0x127   :  { %2411 = vmatpush1.bf16.msra.mxu0 %v3496_v44  ;;  %v3465_v44 = vld [vmem:[#allocation5 + $0x76c] ss:$16 sps:$4 sm:$0xff]  }
 0x128   :  { %2412 = vmatprep.subr.bf16.mxu0 %v3501_v45  ;;  %v3463_v45 = vld [vmem:[#allocation5 + $0x768] ss:$16 sps:$4 sm:$0xff]  }
 0x129   :  { %1928 = vmatpush1.bf16.msra.mxu1 %v3403_v46  ;;  %v3468_v46 = vld [vmem:[#allocation5 + $0x78c] ss:$16 sps:$4 sm:$0xff]  }
 0x12a   :  { %1929 = vmatprep.subr.bf16.mxu1 %v3408_v47  ;;  %v3466_v47 = vld [vmem:[#allocation5 + $0x788] ss:$16 sps:$4 sm:$0xff]  }
 0x12b   :  { %2413 = vmatpush1.bf16.msra.mxu0 %v3499_v48  ;;  %v3471_v48 = vld [vmem:[#allocation5 + $0x7ac] ss:$16 sps:$4 sm:$0xff]  }
 0x12c   :  { %2414 = vmatprep.subr.bf16.mxu0 %v3504_v49  ;;  %v3469_v49 = vld [vmem:[#allocation5 + $0x7a8] ss:$16 sps:$4 sm:$0xff]  }
 0x12d   :  { %1930 = vmatpush1.bf16.msra.mxu1 %v3406_v50  ;;  %v3474_v50 = vld [vmem:[#allocation5 + $0x7cc] ss:$16 sps:$4 sm:$0xff]  }
 0x12e   :  { %1931 = vmatprep.subr.bf16.mxu1 %v3411_v52  ;;  %v3472_v52 = vld [vmem:[#allocation5 + $0x7c8] ss:$16 sps:$4 sm:$0xff]  }
 0x12f   :  { %2415 = vmatpush1.bf16.msra.mxu0 %v3502_v53  ;;  %v3477_v53 = vld [vmem:[#allocation5 + $0x7ec] ss:$16 sps:$4 sm:$0xff]  }
 0x130   :  { %2416 = vmatprep.subr.bf16.mxu0 %v3507_v54  ;;  %v3475_v54 = vld [vmem:[#allocation5 + $0x7e8] ss:$16 sps:$4 sm:$0xff]  }
 0x131   :  { %1932 = vmatpush1.bf16.msra.mxu1 %v3409_v55  ;;  %v339_v55 = vlaneseq }
 0x132   :  { %1933 = vmatprep.subr.bf16.mxu1 %v3414_v56 }
 0x133   :  { %2417 = vmatpush1.bf16.msra.mxu0 %v3505_v57  ;;  %v3841_v56 = vshrl.u32 %v339_v55, 7 }
 0x134   :  { %2418 = vmatprep.subr.bf16.mxu0 %v3510_v58  ;;  %v3847_v58 = vld [vmem:[%s3886_s4] sm:$0xf] }
 0x135   :  { %1934 = vmatpush1.bf16.msra.mxu1 %v3412_v59  ;;  %v341_v57 = vsub.s32 0, %v3841_v56  ;;  %v345_v59 = vsub.s32 1, %v3841_v56 }
 0x136   :  { %1935 = vmatprep.subr.bf16.mxu1 %v3417_v60 }
 0x137   :  { %2419 = vmatpush1.bf16.msra.mxu0 %v3508_v61  ;;  %v342_v60 = vrot.slane %v3847_v58, %v341_v57 }
 0x138   :  { %2420 = vmatprep.subr.bf16.mxu0 %v3513_v62 }
 0x139   :  { %1936 = vmatpush1.bf16.msra.mxu1 %v3415_v63 }
 0x13a   :  { %1937 = vmatprep.subr.bf16.mxu1 %v3420_v0 }
 0x13b   :  { %2421 = vmatpush1.bf16.msra.mxu0 %v3511_v1 }
 0x13c   :  { %2422 = vmatprep.subr.bf16.mxu0 %v3516_v2 }
 0x13d   :  { %1938 = vmatpush1.bf16.msra.mxu1 %v3418_v3 }
 0x13e   :  { %1939 = vmatprep.subr.bf16.mxu1 %v3423_v4 }
 0x13f   :  { %2423 = vmatpush1.bf16.msra.mxu0 %v3514_v5 }
 0x140   :  { %2424 = vmatprep.subr.bf16.mxu0 %v3519_v8 }
 0x141   :  { %1940 = vmatpush1.bf16.msra.mxu1 %v3421_v9 }
 0x142   :  { %1941 = vmatprep.subr.bf16.mxu1 %v3426_v10  ;;  %v3526_v10 = vld [vmem:[#allocation7 + $0x100] ss:$8 sps:$4 sm:$0xff]  }
 0x143   :  { %2425 = vmatpush1.bf16.msra.mxu0 %v3517_v11 }
 0x144   :  { %2426 = vmatprep.subr.bf16.mxu0 %v3522_v29  ;;  %v3538_v29 = vld [vmem:[#allocation7 + $0x140] ss:$8 sps:$4 sm:$0xff]  }
 0x145   :  { %1942 = vmatpush1.bf16.msra.mxu1 %v3424_v12  ;;  %v3531_v12 = vld [vmem:[#allocation7 + $0x114] ss:$8 sps:$4 sm:$0xff]  }
 0x146   :  { %1943 = vmatprep.subr.bf16.mxu1 %v3429_v14  ;;  %v3574_v14 = vld [vmem:[#allocation8 + $0x40] sm:$0xff]  }
 0x147   :  { %2427 = vmatpush1.bf16.msra.mxu0 %v3520_v7  ;;  %v3583_v7 = vld [vmem:[#allocation8 + $0x20] sm:$0xff]  }
 0x148   :  { %2428 = vmatprep.subr.bf16.mxu0 %v3525_v33  ;;  %v3549_v33 = vld [vmem:[#allocation7 + $0x174] ss:$8 sps:$4 sm:$0xff]  }
 0x149   :  { %1944 = vmatpush1.bf16.msra.mxu1 %v3427_v15  ;;  %v3575_v15 = vld [vmem:[#allocation8] sm:$0xff]  }
 0x14a   :  { %1954 = vmatprep.subr.bf16.mxu1 %v3432_v16  ;;  %v3576_v16 = vld [vmem:[#allocation8 + $0x48] sm:$0xff]  }
 0x14b   :  { %2429 = vmatpush1.bf16.msra.mxu0 %v3523_v35  ;;  %v3547_v35 = vld [vmem:[#allocation7 + $0x170] ss:$8 sps:$4 sm:$0xff]  }
 0x14c   :  { %1946 = vmatmul.mubr.bf16.vlgmr.msra.gmra.mrb[4].mxu1 %v3819_v13  ;;  %v3445_v13 = vld [vmem:[#allocation5 + $0x6a8] ss:$16 sps:$4 sm:$0xff]   ;;  %2439 = vmatprep.subr.bf16.mxu0 %v3528_v38  ;;  %v3555_v38 = vld [vmem:[#allocation7 + $0x194] ss:$8 sps:$4 sm:$0xff]  }
 0x14d   :  { %1955 = vmatpush1.bf16.msra.mxu1 %v3430_v17  ;;  %1986 = vmatprep.mubr.bf16.mxu1 %v3825_v19  ;;  %v3529_v17 = vld [vmem:[#allocation7 + $0x110] ss:$8 sps:$4 sm:$0xff]  }
 0x14e   :  { %1956 = vmatprep.subr.bf16.mxu1 %v3435_v20  ;;  %v3534_v20 = vld [vmem:[#allocation7 + $0x124] ss:$8 sps:$4 sm:$0xff]  }
 0x151   :  { %1957 = vmatpush1.bf16.msra.mxu1 %v3433_v22  ;;  %v3577_v22 = vld [vmem:[#allocation8 + $0x8] sm:$0xff]  }
 0x152   :  { %1958 = vmatprep.subr.bf16.mxu1 %v3438_v23  ;;  %v3578_v23 = vld [vmem:[#allocation8 + $0x50] sm:$0xff]  }
 0x155   :  { %1959 = vmatpush1.bf16.msra.mxu1 %v3436_v24  ;;  %v3532_v24 = vld [vmem:[#allocation7 + $0x120] ss:$8 sps:$4 sm:$0xff]  }
 0x156   :  { %1960 = vmatprep.subr.bf16.mxu1 %v3441_v25  ;;  %v3537_v25 = vld [vmem:[#allocation7 + $0x134] ss:$8 sps:$4 sm:$0xff]  }
 0x159   :  { %1961 = vmatpush1.bf16.msra.mxu1 %v3439_v26  ;;  %v3579_v26 = vld [vmem:[#allocation8 + $0x10] sm:$0xff]  }
 0x15a   :  { %1962 = vmatprep.subr.bf16.mxu1 %v3444_v6  ;;  %v3580_v6 = vld [vmem:[#allocation8 + $0x58] sm:$0xff]  }
 0x15d   :  { %1963 = vmatpush1.bf16.msra.mxu1 %v3442_v18  ;;  %v3535_v18 = vld [vmem:[#allocation7 + $0x130] ss:$8 sps:$4 sm:$0xff]  }
 0x15e   :  { %1964 = vmatprep.subr.bf16.mxu1 %v3447_v27  ;;  %v3540_v27 = vld [vmem:[#allocation7 + $0x144] ss:$8 sps:$4 sm:$0xff]  }
 0x15f   :  { %v1701_v19 = vpop.f32.mrb[0].mxu1 }
 0x160   :  { %v1703_v30 = vpop.f32.mrb[1].mxu1  ;;  %v1702_v61 = vadd.f32 %v1701_v19, %v342_v60  ;;  %v3543_v19 = vld [vmem:[#allocation7 + $0x154] ss:$8 sps:$4 sm:$0xff]  }
 0x161   :  { %v1705_v31 = vpop.f32.mrb[2].mxu1  ;;  %1965 = vmatpush1.bf16.msra.mxu1 %v3445_v13  ;;  %v3581_v13 = vld [vmem:[#allocation8 + $0x18] sm:$0xff]  }
 0x162   :  { %v1706_v34 = vpop.f32.mrb[3].mxu1  ;;  %1966 = vmatprep.subr.bf16.mxu1 %v3450_v28  ;;  %v3582_v28 = vld [vmem:[#allocation8 + $0x60] sm:$0xff]   ;;  %v3541_v31 = vld [vmem:[#allocation7 + $0x150] ss:$8 sps:$4 sm:$0xff]  }
 0x163   :  { %v3585_v34 = vld [vmem:[#allocation8 + $0x28] sm:$0xff]  }
 0x165   :  { %1967 = vmatpush1.bf16.msra.mxu1 %v3448_v32  ;;  %v3546_v32 = vld [vmem:[#allocation7 + $0x164] ss:$8 sps:$4 sm:$0xff]  }
 0x166   :  { %1968 = vmatprep.subr.bf16.mxu1 %v3453_v51  ;;  %v3544_v51 = vld [vmem:[#allocation7 + $0x160] ss:$8 sps:$4 sm:$0xff]  }
 0x169   :  { %1969 = vmatpush1.bf16.msra.mxu1 %v3451_v36  ;;  %v3552_v36 = vld [vmem:[#allocation7 + $0x184] ss:$8 sps:$4 sm:$0xff]  }
 0x16a   :  { %1970 = vmatprep.subr.bf16.mxu1 %v3456_v37  ;;  %v3550_v37 = vld [vmem:[#allocation7 + $0x180] ss:$8 sps:$4 sm:$0xff]  }
 0x16d   :  { %1971 = vmatpush1.bf16.msra.mxu1 %v3454_v39  ;;  %v3553_v39 = vld [vmem:[#allocation7 + $0x190] ss:$8 sps:$4 sm:$0xff]  }
 0x16e   :  { %1972 = vmatprep.subr.bf16.mxu1 %v3459_v40  ;;  %v3558_v40 = vld [vmem:[#allocation7 + $0x1a4] ss:$8 sps:$4 sm:$0xff]  }
 0x171   :  { %1973 = vmatpush1.bf16.msra.mxu1 %v3457_v41  ;;  %v3556_v41 = vld [vmem:[#allocation7 + $0x1a0] ss:$8 sps:$4 sm:$0xff]  }
 0x172   :  { %1974 = vmatprep.subr.bf16.mxu1 %v3462_v42  ;;  %v3561_v42 = vld [vmem:[#allocation7 + $0x1b4] ss:$8 sps:$4 sm:$0xff]  }
 0x175   :  { %1975 = vmatpush1.bf16.msra.mxu1 %v3460_v43  ;;  %v3559_v43 = vld [vmem:[#allocation7 + $0x1b0] ss:$8 sps:$4 sm:$0xff]  }
 0x176   :  { %1976 = vmatprep.subr.bf16.mxu1 %v3465_v44  ;;  %v3564_v44 = vld [vmem:[#allocation7 + $0x1c4] ss:$8 sps:$4 sm:$0xff]  }
 0x179   :  { %1977 = vmatpush1.bf16.msra.mxu1 %v3463_v45  ;;  %v3562_v45 = vld [vmem:[#allocation7 + $0x1c0] ss:$8 sps:$4 sm:$0xff]  }
 0x17a   :  { %1978 = vmatprep.subr.bf16.mxu1 %v3468_v46  ;;  %v3567_v46 = vld [vmem:[#allocation7 + $0x1d4] ss:$8 sps:$4 sm:$0xff]  }
 0x17d   :  { %1979 = vmatpush1.bf16.msra.mxu1 %v3466_v47  ;;  %v3565_v47 = vld [vmem:[#allocation7 + $0x1d0] ss:$8 sps:$4 sm:$0xff]  }
 0x17e   :  { %1980 = vmatprep.subr.bf16.mxu1 %v3471_v48  ;;  %v3570_v48 = vld [vmem:[#allocation7 + $0x1e4] ss:$8 sps:$4 sm:$0xff]  }
 0x181   :  { %1981 = vmatpush1.bf16.msra.mxu1 %v3469_v49  ;;  %v3568_v49 = vld [vmem:[#allocation7 + $0x1e0] ss:$8 sps:$4 sm:$0xff]  }
 0x182   :  { %1982 = vmatprep.subr.bf16.mxu1 %v3474_v50  ;;  %v3573_v50 = vld [vmem:[#allocation7 + $0x1f4] ss:$8 sps:$4 sm:$0xff]  }
 0x185   :  { %1983 = vmatpush1.bf16.msra.mxu1 %v3472_v52  ;;  %v3571_v52 = vld [vmem:[#allocation7 + $0x1f0] ss:$8 sps:$4 sm:$0xff]  }
 0x186   :  { %1984 = vmatprep.subr.bf16.mxu1 %v3477_v53  ;;  %v349_v53 = vsub.s32 2, %v3841_v56 }
 0x188   :  { %v350_v55 = vrot.slane %v3847_v58, %v349_v53 }
 0x189   :  { %1985 = vmatpush1.bf16.msra.mxu1 %v3475_v54  ;;  %v353_v54 = vsub.s32 3, %v3841_v56 }
 0x18a   :  { %3021 = vmatprep.subr.bf16.mxu1 %v3574_v14 }
 0x18b   :  { %v354_v60 = vrot.slane %v3847_v58, %v353_v54 }
 0x18c   :  { %1987 = vmatmul.mubr.bf16.vlgmr.msra.gmra.mrb[4].mxu1 %v3833_v21  ;;  %v346_v21 = vrot.slane %v3847_v58, %v345_v59  ;;  %v76_v58 = vld [vmem:[%s3886_s4 + $0x4] sm:$0x3] }
 0x18d   :  { %3022 = vmatpush3.bf16.msra.mxu1 %v3575_v15  ;;  %v2075_v14 = vrot.slane %v76_v58, %v345_v59 }
 0x18e   :  { %v1704_v62 = vadd.f32 %v1703_v30, %v346_v21  ;;  %3023 = vmatprep.subr.bf16.mxu1 %v3576_v16  ;;  %v3584_v30 = vld [vmem:[#allocation8 + $0x68] sm:$0xff]  }
 0x191   :  { %3024 = vmatpush3.bf16.msra.mxu1 %v3577_v22 }
 0x192   :  { %3025 = vmatprep.subr.bf16.mxu1 %v3578_v23 }
 0x195   :  { %3026 = vmatpush3.bf16.msra.mxu1 %v3579_v26 }
 0x196   :  { %3027 = vmatprep.subr.bf16.mxu1 %v3580_v6 }
 0x199   :  { %3028 = vmatpush3.bf16.msra.mxu1 %v3581_v13 }
 0x19a   :  { %3029 = vmatprep.subr.bf16.mxu1 %v3582_v28 }
 0x19d   :  { %3030 = vmatpush3.bf16.msra.mxu1 %v3583_v7 }
 0x19e   :  { %3031 = vmatprep.subr.bf16.mxu1 %v3584_v30 }
 0x1a1   :  { %3032 = vmatpush3.bf16.msra.mxu1 %v3585_v34 }
 0x1e0   :  { %v1824_v63 = vpop.f32.mrb[0].mxu0 }
 0x1e1   :  { %v3044_v0 = vadd.f32 %v1824_v63, %v1702_v61  ;;  %v1826_v1 = vpop.f32.mrb[1].mxu0 }
 0x1e2   :  { %v3046_v2 = vadd.f32 %v1826_v1, %v1704_v62  ;;  %v1828_v3 = vpop.f32.mrb[2].mxu0 }
 0x1e3   :  { %v1995_v4 = vmax.f32 %v3044_v0, 0.0  ;;  %v1829_v5 = vpop.f32.mrb[3].mxu0 }
 0x1e4   :  { %v1996_v8 = vmax.f32 %v3046_v2, 0.0 }
 0x1e5   :  { %v1999_v11 = vpack.c.bf16 %v1995_v4, %v1995_v4 }
 0x1e6   :  { %v2000_v9 = vpack.c.bf16 %v1996_v8, %v1996_v8  ;;  %v3586_v8 = vld [vmem:[#allocation8 + $0x70] sm:$0xff]  }
 0x1e7   :  { %3033 = vmatprep.subr.bf16.mxu1 %v3586_v8 }
 0x1e8   :  { %2430 = vmatprep.mubr.bf16.mxu0 %v2000_v9  ;;  %v3587_v9 = vld [vmem:[#allocation8 + $0x30] sm:$0xff]  }
 0x1e9   :  { %2431 = vmatmul.mubr.bf16.vlgmr.msra.gmra.mrb[4].mxu0 %v1999_v11  ;;  %3034 = vmatpush3.bf16.msra.mxu1 %v3587_v9  ;;  %v3589_v11 = vld [vmem:[#allocation8 + $0x38] sm:$0xff]  }
 0x1ea   :  { %2440 = vmatpush1.bf16.msra.mxu0 %v3526_v10  ;;  %v3588_v10 = vld [vmem:[#allocation8 + $0x78] sm:$0xff]  }
 0x1eb   :  { %2441 = vmatprep.subr.bf16.mxu0 %v3531_v12  ;;  %3035 = vmatprep.subr.bf16.mxu1 %v3588_v10  ;;  %v2071_v12 = vrot.slane %v76_v58, %v341_v57  ;;  %v3004_v57 = vld [vmem:[%s3886_s4 + $0x6] ss:$0 sm:$0xff] }
 0x1ed   :  { %3036 = vmatpush3.bf16.msra.mxu1 %v3589_v11 }
 0x1ee   :  { %2442 = vmatpush1.bf16.msra.mxu0 %v3529_v17 }
 0x1ef   :  { %2443 = vmatprep.subr.bf16.mxu0 %v3534_v20 }
 0x1f2   :  { %2444 = vmatpush1.bf16.msra.mxu0 %v3532_v24 }
 0x1f3   :  { %2445 = vmatprep.subr.bf16.mxu0 %v3537_v25 }
 0x1f6   :  { %2446 = vmatpush1.bf16.msra.mxu0 %v3535_v18 }
 0x1f7   :  { %2447 = vmatprep.subr.bf16.mxu0 %v3540_v27 }
 0x1fa   :  { %2448 = vmatpush1.bf16.msra.mxu0 %v3538_v29 }
 0x1fb   :  { %2449 = vmatprep.subr.bf16.mxu0 %v3543_v19 }
 0x1fe   :  { %2450 = vmatpush1.bf16.msra.mxu0 %v3541_v31 }
 0x1ff   :  { %2451 = vmatprep.subr.bf16.mxu0 %v3546_v32 }
 0x202   :  { %2452 = vmatpush1.bf16.msra.mxu0 %v3544_v51 }
 0x203   :  { %2453 = vmatprep.subr.bf16.mxu0 %v3549_v33 }
 0x206   :  { %2454 = vmatpush1.bf16.msra.mxu0 %v3547_v35 }
 0x207   :  { %2455 = vmatprep.subr.bf16.mxu0 %v3552_v36 }
 0x20a   :  { %2456 = vmatpush1.bf16.msra.mxu0 %v3550_v37 }
 0x20b   :  { %2457 = vmatprep.subr.bf16.mxu0 %v3555_v38 }
 0x20e   :  { %2458 = vmatpush1.bf16.msra.mxu0 %v3553_v39 }
 0x20f   :  { %2459 = vmatprep.subr.bf16.mxu0 %v3558_v40 }
 0x212   :  { %2460 = vmatpush1.bf16.msra.mxu0 %v3556_v41 }
 0x213   :  { %2461 = vmatprep.subr.bf16.mxu0 %v3561_v42 }
 0x216   :  { %2462 = vmatpush1.bf16.msra.mxu0 %v3559_v43 }
 0x217   :  { %2463 = vmatprep.subr.bf16.mxu0 %v3564_v44 }
 0x21a   :  { %2464 = vmatpush1.bf16.msra.mxu0 %v3562_v45 }
 0x21b   :  { %2465 = vmatprep.subr.bf16.mxu0 %v3567_v46 }
 0x21e   :  { %2466 = vmatpush1.bf16.msra.mxu0 %v3565_v47 }
 0x21f   :  { %2467 = vmatprep.subr.bf16.mxu0 %v3570_v48 }
 0x222   :  { %2468 = vmatpush1.bf16.msra.mxu0 %v3568_v49 }
 0x223   :  { %2469 = vmatprep.subr.bf16.mxu0 %v3573_v50 }
 0x226   :  { %2470 = vmatpush1.bf16.msra.mxu0 %v3571_v52 }
 0x25f   :  { %v1988_v21 = vpop.f32.mrb[4].mxu1 }
 0x260   :  { %v3047_v61 = vadd.f32 %v1988_v21, %v350_v55  ;;  %v1990_v62 = vpop.f32.mrb[5].mxu1 }
 0x261   :  { %v3048_v63 = vadd.f32 %v1990_v62, %v354_v60  ;;  %v1992_v0 = vpop.f32.mrb[6].mxu1 }
 0x262   :  { %v1997_v1 = vmax.f32 %v3047_v61, 0.0  ;;  %v1993_v2 = vpop.f32.mrb[7].mxu1 }
 0x263   :  { %v1998_v3 = vmax.f32 %v3048_v63, 0.0 }
 0x264   :  { %v2001_v5 = vpack.c.bf16 %v1997_v1, %v1997_v1 }
 0x265   :  { %v2002_v4 = vpack.c.bf16 %v1998_v3, %v1998_v3 }
 0x267   :  { %2471 = vmatprep.mubr.bf16.mxu0 %v2002_v4 }
 0x268   :  { %2472 = vmatmul.mubr.bf16.vlgmr.msra.gmra.mrb[4].mxu0 %v2001_v5 }
 0x33b   :  { %v2473_v15 = vpop.f32.mrb[4].mxu0 }
 0x33c   :  { %v3049_v16 = vadd.f32 %v2473_v15, %v2071_v12  ;;  %v2475_v17 = vpop.f32.mrb[5].mxu0 }
 0x33d   :  { %v3050_v20 = vadd.f32 %v2475_v17, %v2075_v14  ;;  %v2477_v22 = vpop.f32.mrb[6].mxu0 }
 0x33e   :  { %v2480_v23 = vmax.f32 %v3049_v16, 0.0  ;;  %v2478_v24 = vpop.f32.mrb[7].mxu0 }
 0x33f   :  { %v2481_v25 = vmax.f32 %v3050_v20, 0.0 }
 0x340   :  { %v2482_v6 = vpack.c.bf16 %v2480_v23, %v2480_v23 }
 0x341   :  { %v2483_v26 = vpack.c.bf16 %v2481_v25, %v2481_v25 }
 0x343   :  { %2650 = vmatprep.mubr.bf16.mxu1 %v2483_v26 }
 0x344   :  { %2651 = vmatmul.mubr.bf16.vlgmr.msra.gmra.mrb[8].mxu1 %v2482_v6 }
 0x417   :  { %v3037_v18 = vpop.f32.mrb[8].mxu1 }
 0x418   :  { %v3038_v27 = vpop.f32.mrb[9].mxu1 }
 0x419   :  { %v3039_v56 = vadd.f32 %v3038_v27, %v3037_v18  ;;  %v3040_v59 = vpop.f32.mrb[10].mxu1 }
 0x41a   :  { %v3041_v13 = vpop.f32.mrb[11].mxu1 }
 0x41b   :  { %v2653_v28 = vadd.f32 %v3039_v56, %v3004_v57 }
 0x41d   :  { %2658 = vst [vmem:[#allocation10] sm:$0xff] %v2653_v28 }
 0x41e   :  { %3689 = shalt.err (!%p3686_p8)
}
 0x41f   :  { %s3690_s4 = scalar_lea.hbm %s3887_s5, 128 }
 0x420   :  { %p3691_p9 = scmp.ne.s32.totalorder %s3887_s5, %s3690_s4  ;;  %p3694_p10 = scmp.lt.u32.totalorder %s3690_s4, %s3887_s5 }
 0x422   :  { %p3696_p11 = pnand %p3694_p10, %p3691_p9 }
 0x424   :  { %3699 = shalt.err (!%p3696_p11)
}
 0x425   :  { %2668 = dma.vmem_to_hbm [thread:$0]  %s2666_s24, 128, %s3887_s5, [#allocation4]  }
 0x426   :  { %3706 = dma.done.wait [#allocation4], 128  }
 0x427   :  { %3707 = vsyncadd [#allocation4], 4294967168 }
 0x428   :  { %2672 = vsyncpa [#allocation3], 1 }
 0x429   :  { %2673 = vsyncpa [#allocation6], 1 }
 0x42a   :  { %2674 = vsyncpa [#allocation9], 1 }
 0x42b   :  { %2675 = vsyncpa [#allocation4], 1 }

</bundles_post_ra>
